<compile_context>
chip_gen: v5e
topology: v5e:2x2
jax: 0.10.0
libtpu: 0.0.40
codegen_flags: <defaults>
</compile_context>

<pallas_src>
import math

import jax
import jax.numpy as jnp
from jax.experimental import pallas as pl
from jax.experimental.pallas import tpu as pltpu

NUM_LAYERS = 2
LN_EPS = 1e-5           # PyTorch nn.LayerNorm default
MAX_TILE_B = 256        # safe for v5e/v6e (128 MiB VMEM) and v7x (64 MiB)


def _round_up(n, m):
    return ((n + m - 1) // m) * m


def _layernorm(x, w, b):
    mu = jnp.mean(x, axis=-1, keepdims=True)
    var = jnp.mean((x - mu) ** 2, axis=-1, keepdims=True)
    return (x - mu) * jax.lax.rsqrt(var + LN_EPS) * w + b


def matrix_approximator_kernel(
    x_ref,       # (TILE_B, input_dim)           f32
    bmat2_ref,   # (input_dim, d_model) = [B|B]  f32
    wvo_ref,     # (L, d, d)                     bf16   fused Wv @ Wo
    w1_ref,      # (L, d, ff)                    bf16
    w2_ref,      # (L, ff, d)                    bf16
    wf_ref,      # (d, input_dim)                bf16
    small_ref,   # (L, 8, d) rows: bvo, ln1w, ln1b, b2, ln2w, ln2b, pad, pad  f32
    b1_ref,      # (L, 1, ff)                    f32
    bf_ref,      # (1, input_dim)                f32
    out_ref,     # (TILE_B, input_dim)           f32
):
    num_layers = wvo_ref.shape[0]
    d_model = bmat2_ref.shape[1]
    n_fourier = d_model // 2

    x = x_ref[...]

    # ---- Fourier features: [sin(2*pi*x@B), cos(2*pi*x@B)] without a lane concat.
    # bmat2 = [B | B]; cos(p) == sin(p + pi/2), applied via a per-lane phase.
    proj = (2.0 * math.pi) * jnp.dot(
        x, bmat2_ref[...], preferred_element_type=jnp.float32
    )
    lane = jax.lax.broadcasted_iota(jnp.int32, (1, d_model), 1)
    phase = jnp.where(lane < n_fourier, 0.0, 0.5 * math.pi)
    h = jnp.sin(proj + phase)

    # ---- TransformerEncoder, post-norm, seq_len == 1 (softmax over 1 key == 1).
    for l in range(num_layers):
        bvo = small_ref[l, 0:1, :]
        ln1w = small_ref[l, 1:2, :]
        ln1b = small_ref[l, 2:3, :]
        b2 = small_ref[l, 3:4, :]
        ln2w = small_ref[l, 4:5, :]
        ln2b = small_ref[l, 5:6, :]

        # Fused self-attention (V and out_proj collapsed into one matmul).
        attn = jnp.dot(
            h.astype(jnp.bfloat16), wvo_ref[l], preferred_element_type=jnp.float32
        ) + bvo
        h = _layernorm(h + attn, ln1w, ln1b)

        # Feed-forward: Linear -> ReLU -> Linear.
        ff = jnp.maximum(
            jnp.dot(h.astype(jnp.bfloat16), w1_ref[l],
                    preferred_element_type=jnp.float32) + b1_ref[l],
            0.0,
        )
        ff = jnp.dot(
            ff.astype(jnp.bfloat16), w2_ref[l], preferred_element_type=jnp.float32
        ) + b2
        h = _layernorm(h + ff, ln2w, ln2b)

    # ---- final Linear(d_model -> input_dim)
    out_ref[...] = jnp.dot(
        h.astype(jnp.bfloat16), wf_ref[...], preferred_element_type=jnp.float32
    ) + bf_ref[...]


def matrix_approximator(x, packed_params):
    """x: (batch, s, s) float32.  Returns (batch, s, s) float32."""
    batch, s, s2 = x.shape
    assert s == s2
    input_dim = s * s
    x_flat = x.reshape(batch, input_dim).astype(jnp.float32)

    bmat2, wvo, w1, w2, wf, small, b1, bf = packed_params
    d_model = bmat2.shape[1]
    dim_ff = w1.shape[-1]
    num_layers = wvo.shape[0]

    # Batch tiling: pad to a multiple of 8 sublanes; tile <= MAX_TILE_B so the
    # per-step working set (tile_b x dim_ff f32 FF activation + ~0.5 MiB weights)
    # fits comfortably in every generation's VMEM budget.
    tile_b = min(MAX_TILE_B, _round_up(batch, 8))
    padded = _round_up(batch, tile_b)
    if padded != batch:
        x_flat = jnp.pad(x_flat, ((0, padded - batch), (0, 0)))
    grid = (padded // tile_b,)

    def resident(shape):
        nd = len(shape)
        return pl.BlockSpec(shape, lambda i, _nd=nd: (0,) * _nd)

    in_specs = [
        pl.BlockSpec((tile_b, input_dim), lambda i: (i, 0)),   # x: streamed
        resident(bmat2.shape),
        resident(wvo.shape),
        resident(w1.shape),
        resident(w2.shape),
        resident(wf.shape),
        resident(small.shape),
        resident(b1.shape),
        resident(bf.shape),
    ]
    out_spec = pl.BlockSpec((tile_b, input_dim), lambda i: (i, 0))

    flops = 2 * padded * (
        input_dim * d_model
        + num_layers * (d_model * d_model + 2 * d_model * dim_ff)
        + d_model * input_dim
    )
    bytes_accessed = int(x_flat.size) * 4 + padded * input_dim * 4
    for a in packed_params:
        bytes_accessed += int(a.size) * a.dtype.itemsize
    cost = pl.CostEstimate(
        flops=flops,
        transcendentals=padded * d_model,
        bytes_accessed=bytes_accessed,
    )

    out = pl.pallas_call(
        matrix_approximator_kernel,
        out_shape=jax.ShapeDtypeStruct((padded, input_dim), jnp.float32),
        grid=grid,
        in_specs=in_specs,
        out_specs=out_spec,
        compiler_params=pltpu.CompilerParams(
            dimension_semantics=("parallel",)
        ),
        cost_estimate=cost,
    )(x_flat, bmat2, wvo, w1, w2, wf, small, b1, bf)

    return out[:batch].reshape(batch, s, s)


def init_params(key, input_dim, num_fourier_features, d_model, dim_ff,
                num_layers, sigma=1.0):
    """Natural (PyTorch-shaped, pre-transposed, layer-stacked) parameters."""
    assert d_model == 2 * num_fourier_features, (
        "seq_len==1 path requires d_model == 2 * num_fourier_features")
    ks = jax.random.split(key, 11)
    scale = 0.02

    bmat = sigma * jax.random.normal(ks[0], (input_dim, num_fourier_features), jnp.float32)

    wv = scale * jax.random.normal(ks[1], (num_layers, d_model, d_model), jnp.float32)
    bv = scale * jax.random.normal(ks[2], (num_layers, 1, d_model), jnp.float32)
    wo = scale * jax.random.normal(ks[3], (num_layers, d_model, d_model), jnp.float32)
    bo = scale * jax.random.normal(ks[4], (num_layers, 1, d_model), jnp.float32)
    ln1w = jnp.ones((num_layers, 1, d_model), jnp.float32)
    ln1b = jnp.zeros((num_layers, 1, d_model), jnp.float32)

    w1 = scale * jax.random.normal(ks[5], (num_layers, d_model, dim_ff), jnp.float32)
    b1 = scale * jax.random.normal(ks[6], (num_layers, 1, dim_ff), jnp.float32)
    w2 = scale * jax.random.normal(ks[7], (num_layers, dim_ff, d_model), jnp.float32)
    b2 = scale * jax.random.normal(ks[8], (num_layers, 1, d_model), jnp.float32)
    ln2w = jnp.ones((num_layers, 1, d_model), jnp.float32)
    ln2b = jnp.zeros((num_layers, 1, d_model), jnp.float32)

    wf = scale * jax.random.normal(ks[9], (d_model, input_dim), jnp.float32)
    bf = scale * jax.random.normal(ks[10], (1, input_dim), jnp.float32)

    return dict(bmat=bmat, wv=wv, bv=bv, wo=wo, bo=bo, ln1w=ln1w, ln1b=ln1b,
                w1=w1, b1=b1, w2=w2, b2=b2, ln2w=ln2w, ln2b=ln2b, wf=wf, bf=bf)


def pack_params(p):
    """One-time host-side precompute: fuse V->O, cast big weights to bf16,
    duplicate the Fourier matrix, and pack the tiny per-layer vectors."""
    # Fourier matrix duplicated so sin/cos halves come from one matmul.
    bmat2 = jnp.concatenate([p["bmat"], p["bmat"]], axis=-1)            # (in, d) f32

    # attn = (h @ Wv + bv) @ Wo + bo  ==  h @ (Wv @ Wo) + (bv @ Wo + bo)
    wvo = jnp.einsum("lij,ljk->lik", p["wv"], p["wo"]).astype(jnp.bfloat16)
    bvo = jnp.einsum("lij,ljk->lik", p["bv"], p["wo"]) + p["bo"]         # (L,1,d) f32

    pad = jnp.zeros_like(bvo)
    small = jnp.concatenate(
        [bvo, p["ln1w"], p["ln1b"], p["b2"], p["ln2w"], p["ln2b"], pad, pad],
        axis=1,
    )                                                                    # (L, 8, d) f32

    return (
        bmat2,
        wvo,
        p["w1"].astype(jnp.bfloat16),
        p["w2"].astype(jnp.bfloat16),
        p["wf"].astype(jnp.bfloat16),
        small,
        p["b1"],
        p["bf"],
    )


if __name__ == "__main__":
    # Module hyperparameters (small, consistent with the forward pass).
    input_dim = 16              # x is a 4x4 matrix -> s = 4
    s = int(input_dim ** 0.5)
    num_fourier_features = 16
    d_model = 32                # must equal 2 * num_fourier_features
    nhead = 4                   # numerically irrelevant for seq_len==1
    num_layers = NUM_LAYERS
    dim_feedforward = 2048      # PyTorch TransformerEncoderLayer default

    key = jax.random.PRNGKey(0)
    kx, kp = jax.random.split(key)
    x = jax.random.normal(kx, (2, s, s), jnp.float32)
    params = init_params(kp, input_dim, num_fourier_features, d_model,
                         dim_feedforward, num_layers)
    packed = pack_params(params)

    out = matrix_approximator(x, packed)
    jax.block_until_ready(out)
    assert out.shape == (2, s, s) and out.dtype == jnp.float32
    print("KERNEL_OK")
</pallas_src>

<mosaic_0001>
module attributes {stable_mosaic.version = 11 : i64} {
  func.func @matrix_approximator_kernel(%arg0: i32, %arg1: memref<8x16xf32, #tpu.memory_space<vmem>>, %arg2: memref<16x32xf32, #tpu.memory_space<vmem>>, %arg3: memref<2x32x32xbf16, #tpu.memory_space<vmem>>, %arg4: memref<2x32x2048xbf16, #tpu.memory_space<vmem>>, %arg5: memref<2x2048x32xbf16, #tpu.memory_space<vmem>>, %arg6: memref<32x16xbf16, #tpu.memory_space<vmem>>, %arg7: memref<2x8x32xf32, #tpu.memory_space<vmem>>, %arg8: memref<2x1x2048xf32, #tpu.memory_space<vmem>>, %arg9: memref<1x16xf32, #tpu.memory_space<vmem>>, %arg10: memref<8x16xf32, #tpu.memory_space<vmem>>) attributes {dimension_semantics = [#tpu.dimension_semantics<parallel>], iteration_bounds = array<i64: 1>, scalar_prefetch = 0 : i64, scratch_operands = 0 : i64, tpu.core_type = #tpu.core_type<tc>, window_params = [{transform_indices = @transform_0, window_bounds = array<i64: 8, 16>}, {pipeline_mode = #tpu.pipeline_mode<synchronous>, transform_indices = @transform_1, window_bounds = array<i64: 16, 32>}, {pipeline_mode = #tpu.pipeline_mode<synchronous>, transform_indices = @transform_2, window_bounds = array<i64: 2, 32, 32>}, {pipeline_mode = #tpu.pipeline_mode<synchronous>, transform_indices = @transform_3, window_bounds = array<i64: 2, 32, 2048>}, {pipeline_mode = #tpu.pipeline_mode<synchronous>, transform_indices = @transform_4, window_bounds = array<i64: 2, 2048, 32>}, {pipeline_mode = #tpu.pipeline_mode<synchronous>, transform_indices = @transform_5, window_bounds = array<i64: 32, 16>}, {pipeline_mode = #tpu.pipeline_mode<synchronous>, transform_indices = @transform_6, window_bounds = array<i64: 2, 8, 32>}, {pipeline_mode = #tpu.pipeline_mode<synchronous>, transform_indices = @transform_7, window_bounds = array<i64: 2, 1, 2048>}, {pipeline_mode = #tpu.pipeline_mode<synchronous>, transform_indices = @transform_8, window_bounds = array<i64: 1, 16>}, {transform_indices = @transform_9, window_bounds = array<i64: 8, 16>}]} {
    %c0 = arith.constant 0 : index
    %c0_0 = arith.constant 0 : index
    %0 = vector.load %arg1[%c0, %c0_0] : memref<8x16xf32, #tpu.memory_space<vmem>>, vector<8x16xf32>
    %c0_1 = arith.constant 0 : index
    %c0_2 = arith.constant 0 : index
    %1 = vector.load %arg2[%c0_1, %c0_2] : memref<16x32xf32, #tpu.memory_space<vmem>>, vector<16x32xf32>
    %cst = arith.constant dense<0.000000e+00> : vector<8x32xf32>
    %2 = tpu.matmul %0, %1, %cst {dimension_numbers = #tpu.dot_dimension_numbers<[1], [0], [0], [1], [0, 0, 1, 1], [], []>} : vector<8x16xf32>, vector<16x32xf32>, vector<8x32xf32> -> vector<8x32xf32>
    %cst_3 = arith.constant 6.28318548 : f32
    %3 = vector.broadcast %cst_3 : f32 to vector<8x32xf32>
    %4 = arith.mulf %3, %2 : vector<8x32xf32>
    %5 = tpu.iota {dimensions = array<i32: 1>} : vector<1x32xi32>
    %c16_i32 = arith.constant 16 : i32
    %6 = vector.broadcast %c16_i32 : i32 to vector<1x32xi32>
    %7 = arith.cmpi slt, %5, %6 : vector<1x32xi32>
    %cst_4 = arith.constant 0.000000e+00 : f32
    %cst_5 = arith.constant 1.57079637 : f32
    %8 = vector.broadcast %cst_4 : f32 to vector<1x32xf32>
    %9 = vector.broadcast %cst_5 : f32 to vector<1x32xf32>
    %10 = arith.select %7, %8, %9 : vector<1x32xi1>, vector<1x32xf32>
    %11 = vector.broadcast %10 : vector<1x32xf32> to vector<8x32xf32>
    %12 = arith.addf %4, %11 : vector<8x32xf32>
    %13 = math.sin %12 : vector<8x32xf32>
    %c0_6 = arith.constant 0 : index
    %c0_7 = arith.constant 0 : index
    %c0_8 = arith.constant 0 : index
    %14 = vector.load %arg7[%c0_6, %c0_7, %c0_8] : memref<2x8x32xf32, #tpu.memory_space<vmem>>, vector<1x1x32xf32>
    %15 = vector.shape_cast %14 : vector<1x1x32xf32> to vector<1x32xf32>
    %c0_9 = arith.constant 0 : index
    %c1 = arith.constant 1 : index
    %c0_10 = arith.constant 0 : index
    %16 = vector.load %arg7[%c0_9, %c1, %c0_10] : memref<2x8x32xf32, #tpu.memory_space<vmem>>, vector<1x1x32xf32>
    %17 = vector.shape_cast %16 : vector<1x1x32xf32> to vector<1x32xf32>
    %c0_11 = arith.constant 0 : index
    %c2 = arith.constant 2 : index
    %c0_12 = arith.constant 0 : index
    %18 = vector.load %arg7[%c0_11, %c2, %c0_12] : memref<2x8x32xf32, #tpu.memory_space<vmem>>, vector<1x1x32xf32>
    %19 = vector.shape_cast %18 : vector<1x1x32xf32> to vector<1x32xf32>
    %c0_13 = arith.constant 0 : index
    %c3 = arith.constant 3 : index
    %c0_14 = arith.constant 0 : index
    %20 = vector.load %arg7[%c0_13, %c3, %c0_14] : memref<2x8x32xf32, #tpu.memory_space<vmem>>, vector<1x1x32xf32>
    %21 = vector.shape_cast %20 : vector<1x1x32xf32> to vector<1x32xf32>
    %c0_15 = arith.constant 0 : index
    %c4 = arith.constant 4 : index
    %c0_16 = arith.constant 0 : index
    %22 = vector.load %arg7[%c0_15, %c4, %c0_16] : memref<2x8x32xf32, #tpu.memory_space<vmem>>, vector<1x1x32xf32>
    %23 = vector.shape_cast %22 : vector<1x1x32xf32> to vector<1x32xf32>
    %c0_17 = arith.constant 0 : index
    %c5 = arith.constant 5 : index
    %c0_18 = arith.constant 0 : index
    %24 = vector.load %arg7[%c0_17, %c5, %c0_18] : memref<2x8x32xf32, #tpu.memory_space<vmem>>, vector<1x1x32xf32>
    %25 = vector.shape_cast %24 : vector<1x1x32xf32> to vector<1x32xf32>
    %26 = arith.truncf %13 : vector<8x32xf32> to vector<8x32xbf16>
    %c0_19 = arith.constant 0 : index
    %c0_20 = arith.constant 0 : index
    %c0_21 = arith.constant 0 : index
    %27 = vector.load %arg3[%c0_19, %c0_20, %c0_21] : memref<2x32x32xbf16, #tpu.memory_space<vmem>>, vector<1x32x32xbf16>
    %28 = vector.shape_cast %27 : vector<1x32x32xbf16> to vector<32x32xbf16>
    %cst_22 = arith.constant dense<0.000000e+00> : vector<8x32xf32>
    %29 = tpu.matmul %26, %28, %cst_22 {dimension_numbers = #tpu.dot_dimension_numbers<[1], [0], [0], [1], [0, 0, 1, 1], [], []>} : vector<8x32xbf16>, vector<32x32xbf16>, vector<8x32xf32> -> vector<8x32xf32>
    %30 = vector.broadcast %15 : vector<1x32xf32> to vector<8x32xf32>
    %31 = arith.addf %29, %30 : vector<8x32xf32>
    %32 = arith.addf %13, %31 : vector<8x32xf32>
    %cst_23 = arith.constant dense<0.000000e+00> : vector<8xf32>
    %33 = vector.multi_reduction <add>, %32, %cst_23 [1] : vector<8x32xf32> to vector<8xf32>
    %34 = vector.shape_cast %33 : vector<8xf32> to vector<8x1xf32>
    %cst_24 = arith.constant 3.200000e+01 : f32
    %35 = vector.broadcast %cst_24 : f32 to vector<8x1xf32>
    %36 = arith.divf %34, %35 : vector<8x1xf32>
    %37 = vector.broadcast %36 : vector<8x1xf32> to vector<8x32xf32>
    %38 = arith.subf %32, %37 : vector<8x32xf32>
    %39 = arith.mulf %38, %38 : vector<8x32xf32>
    %cst_25 = arith.constant dense<0.000000e+00> : vector<8xf32>
    %40 = vector.multi_reduction <add>, %39, %cst_25 [1] : vector<8x32xf32> to vector<8xf32>
    %41 = vector.shape_cast %40 : vector<8xf32> to vector<8x1xf32>
    %cst_26 = arith.constant 3.200000e+01 : f32
    %42 = vector.broadcast %cst_26 : f32 to vector<8x1xf32>
    %43 = arith.divf %41, %42 : vector<8x1xf32>
    %44 = vector.broadcast %36 : vector<8x1xf32> to vector<8x32xf32>
    %45 = arith.subf %32, %44 : vector<8x32xf32>
    %cst_27 = arith.constant 9.99999974E-6 : f32
    %46 = vector.broadcast %cst_27 : f32 to vector<8x1xf32>
    %47 = arith.addf %43, %46 : vector<8x1xf32>
    %48 = math.rsqrt %47 : vector<8x1xf32>
    %49 = vector.broadcast %48 : vector<8x1xf32> to vector<8x32xf32>
    %50 = arith.mulf %45, %49 : vector<8x32xf32>
    %51 = vector.broadcast %17 : vector<1x32xf32> to vector<8x32xf32>
    %52 = arith.mulf %50, %51 : vector<8x32xf32>
    %53 = vector.broadcast %19 : vector<1x32xf32> to vector<8x32xf32>
    %54 = arith.addf %52, %53 : vector<8x32xf32>
    %55 = arith.truncf %54 : vector<8x32xf32> to vector<8x32xbf16>
    %c0_28 = arith.constant 0 : index
    %c0_29 = arith.constant 0 : index
    %c0_30 = arith.constant 0 : index
    %56 = vector.load %arg4[%c0_28, %c0_29, %c0_30] : memref<2x32x2048xbf16, #tpu.memory_space<vmem>>, vector<1x32x2048xbf16>
    %57 = vector.shape_cast %56 : vector<1x32x2048xbf16> to vector<32x2048xbf16>
    %cst_31 = arith.constant dense<0.000000e+00> : vector<8x2048xf32>
    %58 = tpu.matmul %55, %57, %cst_31 {dimension_numbers = #tpu.dot_dimension_numbers<[1], [0], [0], [1], [0, 0, 1, 1], [], []>} : vector<8x32xbf16>, vector<32x2048xbf16>, vector<8x2048xf32> -> vector<8x2048xf32>
    %c0_32 = arith.constant 0 : index
    %c0_33 = arith.constant 0 : index
    %c0_34 = arith.constant 0 : index
    %59 = vector.load %arg8[%c0_32, %c0_33, %c0_34] : memref<2x1x2048xf32, #tpu.memory_space<vmem>>, vector<1x1x2048xf32>
    %60 = vector.shape_cast %59 : vector<1x1x2048xf32> to vector<1x2048xf32>
    %61 = vector.broadcast %60 : vector<1x2048xf32> to vector<8x2048xf32>
    %62 = arith.addf %58, %61 : vector<8x2048xf32>
    %cst_35 = arith.constant 0.000000e+00 : f32
    %63 = vector.broadcast %cst_35 : f32 to vector<8x2048xf32>
    %64 = arith.maximumf %62, %63 : vector<8x2048xf32>
    %65 = arith.truncf %64 : vector<8x2048xf32> to vector<8x2048xbf16>
    %c0_36 = arith.constant 0 : index
    %c0_37 = arith.constant 0 : index
    %c0_38 = arith.constant 0 : index
    %66 = vector.load %arg5[%c0_36, %c0_37, %c0_38] : memref<2x2048x32xbf16, #tpu.memory_space<vmem>>, vector<1x2048x32xbf16>
    %67 = vector.shape_cast %66 : vector<1x2048x32xbf16> to vector<2048x32xbf16>
    %cst_39 = arith.constant dense<0.000000e+00> : vector<8x32xf32>
    %68 = tpu.matmul %65, %67, %cst_39 {dimension_numbers = #tpu.dot_dimension_numbers<[1], [0], [0], [1], [0, 0, 1, 1], [], []>} : vector<8x2048xbf16>, vector<2048x32xbf16>, vector<8x32xf32> -> vector<8x32xf32>
    %69 = vector.broadcast %21 : vector<1x32xf32> to vector<8x32xf32>
    %70 = arith.addf %68, %69 : vector<8x32xf32>
    %71 = arith.addf %54, %70 : vector<8x32xf32>
    %cst_40 = arith.constant dense<0.000000e+00> : vector<8xf32>
    %72 = vector.multi_reduction <add>, %71, %cst_40 [1] : vector<8x32xf32> to vector<8xf32>
    %73 = vector.shape_cast %72 : vector<8xf32> to vector<8x1xf32>
    %cst_41 = arith.constant 3.200000e+01 : f32
    %74 = vector.broadcast %cst_41 : f32 to vector<8x1xf32>
    %75 = arith.divf %73, %74 : vector<8x1xf32>
    %76 = vector.broadcast %75 : vector<8x1xf32> to vector<8x32xf32>
    %77 = arith.subf %71, %76 : vector<8x32xf32>
    %78 = arith.mulf %77, %77 : vector<8x32xf32>
    %cst_42 = arith.constant dense<0.000000e+00> : vector<8xf32>
    %79 = vector.multi_reduction <add>, %78, %cst_42 [1] : vector<8x32xf32> to vector<8xf32>
    %80 = vector.shape_cast %79 : vector<8xf32> to vector<8x1xf32>
    %cst_43 = arith.constant 3.200000e+01 : f32
    %81 = vector.broadcast %cst_43 : f32 to vector<8x1xf32>
    %82 = arith.divf %80, %81 : vector<8x1xf32>
    %83 = vector.broadcast %75 : vector<8x1xf32> to vector<8x32xf32>
    %84 = arith.subf %71, %83 : vector<8x32xf32>
    %cst_44 = arith.constant 9.99999974E-6 : f32
    %85 = vector.broadcast %cst_44 : f32 to vector<8x1xf32>
    %86 = arith.addf %82, %85 : vector<8x1xf32>
    %87 = math.rsqrt %86 : vector<8x1xf32>
    %88 = vector.broadcast %87 : vector<8x1xf32> to vector<8x32xf32>
    %89 = arith.mulf %84, %88 : vector<8x32xf32>
    %90 = vector.broadcast %23 : vector<1x32xf32> to vector<8x32xf32>
    %91 = arith.mulf %89, %90 : vector<8x32xf32>
    %92 = vector.broadcast %25 : vector<1x32xf32> to vector<8x32xf32>
    %93 = arith.addf %91, %92 : vector<8x32xf32>
    %c1_45 = arith.constant 1 : index
    %c0_46 = arith.constant 0 : index
    %c0_47 = arith.constant 0 : index
    %94 = vector.load %arg7[%c1_45, %c0_46, %c0_47] : memref<2x8x32xf32, #tpu.memory_space<vmem>>, vector<1x1x32xf32>
    %95 = vector.shape_cast %94 : vector<1x1x32xf32> to vector<1x32xf32>
    %c1_48 = arith.constant 1 : index
    %c1_49 = arith.constant 1 : index
    %c0_50 = arith.constant 0 : index
    %96 = vector.load %arg7[%c1_48, %c1_49, %c0_50] : memref<2x8x32xf32, #tpu.memory_space<vmem>>, vector<1x1x32xf32>
    %97 = vector.shape_cast %96 : vector<1x1x32xf32> to vector<1x32xf32>
    %c1_51 = arith.constant 1 : index
    %c2_52 = arith.constant 2 : index
    %c0_53 = arith.constant 0 : index
    %98 = vector.load %arg7[%c1_51, %c2_52, %c0_53] : memref<2x8x32xf32, #tpu.memory_space<vmem>>, vector<1x1x32xf32>
    %99 = vector.shape_cast %98 : vector<1x1x32xf32> to vector<1x32xf32>
    %c1_54 = arith.constant 1 : index
    %c3_55 = arith.constant 3 : index
    %c0_56 = arith.constant 0 : index
    %100 = vector.load %arg7[%c1_54, %c3_55, %c0_56] : memref<2x8x32xf32, #tpu.memory_space<vmem>>, vector<1x1x32xf32>
    %101 = vector.shape_cast %100 : vector<1x1x32xf32> to vector<1x32xf32>
    %c1_57 = arith.constant 1 : index
    %c4_58 = arith.constant 4 : index
    %c0_59 = arith.constant 0 : index
    %102 = vector.load %arg7[%c1_57, %c4_58, %c0_59] : memref<2x8x32xf32, #tpu.memory_space<vmem>>, vector<1x1x32xf32>
    %103 = vector.shape_cast %102 : vector<1x1x32xf32> to vector<1x32xf32>
    %c1_60 = arith.constant 1 : index
    %c5_61 = arith.constant 5 : index
    %c0_62 = arith.constant 0 : index
    %104 = vector.load %arg7[%c1_60, %c5_61, %c0_62] : memref<2x8x32xf32, #tpu.memory_space<vmem>>, vector<1x1x32xf32>
    %105 = vector.shape_cast %104 : vector<1x1x32xf32> to vector<1x32xf32>
    %106 = arith.truncf %93 : vector<8x32xf32> to vector<8x32xbf16>
    %c1_63 = arith.constant 1 : index
    %c0_64 = arith.constant 0 : index
    %c0_65 = arith.constant 0 : index
    %107 = vector.load %arg3[%c1_63, %c0_64, %c0_65] : memref<2x32x32xbf16, #tpu.memory_space<vmem>>, vector<1x32x32xbf16>
    %108 = vector.shape_cast %107 : vector<1x32x32xbf16> to vector<32x32xbf16>
    %cst_66 = arith.constant dense<0.000000e+00> : vector<8x32xf32>
    %109 = tpu.matmul %106, %108, %cst_66 {dimension_numbers = #tpu.dot_dimension_numbers<[1], [0], [0], [1], [0, 0, 1, 1], [], []>} : vector<8x32xbf16>, vector<32x32xbf16>, vector<8x32xf32> -> vector<8x32xf32>
    %110 = vector.broadcast %95 : vector<1x32xf32> to vector<8x32xf32>
    %111 = arith.addf %109, %110 : vector<8x32xf32>
    %112 = arith.addf %93, %111 : vector<8x32xf32>
    %cst_67 = arith.constant dense<0.000000e+00> : vector<8xf32>
    %113 = vector.multi_reduction <add>, %112, %cst_67 [1] : vector<8x32xf32> to vector<8xf32>
    %114 = vector.shape_cast %113 : vector<8xf32> to vector<8x1xf32>
    %cst_68 = arith.constant 3.200000e+01 : f32
    %115 = vector.broadcast %cst_68 : f32 to vector<8x1xf32>
    %116 = arith.divf %114, %115 : vector<8x1xf32>
    %117 = vector.broadcast %116 : vector<8x1xf32> to vector<8x32xf32>
    %118 = arith.subf %112, %117 : vector<8x32xf32>
    %119 = arith.mulf %118, %118 : vector<8x32xf32>
    %cst_69 = arith.constant dense<0.000000e+00> : vector<8xf32>
    %120 = vector.multi_reduction <add>, %119, %cst_69 [1] : vector<8x32xf32> to vector<8xf32>
    %121 = vector.shape_cast %120 : vector<8xf32> to vector<8x1xf32>
    %cst_70 = arith.constant 3.200000e+01 : f32
    %122 = vector.broadcast %cst_70 : f32 to vector<8x1xf32>
    %123 = arith.divf %121, %122 : vector<8x1xf32>
    %124 = vector.broadcast %116 : vector<8x1xf32> to vector<8x32xf32>
    %125 = arith.subf %112, %124 : vector<8x32xf32>
    %cst_71 = arith.constant 9.99999974E-6 : f32
    %126 = vector.broadcast %cst_71 : f32 to vector<8x1xf32>
    %127 = arith.addf %123, %126 : vector<8x1xf32>
    %128 = math.rsqrt %127 : vector<8x1xf32>
    %129 = vector.broadcast %128 : vector<8x1xf32> to vector<8x32xf32>
    %130 = arith.mulf %125, %129 : vector<8x32xf32>
    %131 = vector.broadcast %97 : vector<1x32xf32> to vector<8x32xf32>
    %132 = arith.mulf %130, %131 : vector<8x32xf32>
    %133 = vector.broadcast %99 : vector<1x32xf32> to vector<8x32xf32>
    %134 = arith.addf %132, %133 : vector<8x32xf32>
    %135 = arith.truncf %134 : vector<8x32xf32> to vector<8x32xbf16>
    %c1_72 = arith.constant 1 : index
    %c0_73 = arith.constant 0 : index
    %c0_74 = arith.constant 0 : index
    %136 = vector.load %arg4[%c1_72, %c0_73, %c0_74] : memref<2x32x2048xbf16, #tpu.memory_space<vmem>>, vector<1x32x2048xbf16>
    %137 = vector.shape_cast %136 : vector<1x32x2048xbf16> to vector<32x2048xbf16>
    %cst_75 = arith.constant dense<0.000000e+00> : vector<8x2048xf32>
    %138 = tpu.matmul %135, %137, %cst_75 {dimension_numbers = #tpu.dot_dimension_numbers<[1], [0], [0], [1], [0, 0, 1, 1], [], []>} : vector<8x32xbf16>, vector<32x2048xbf16>, vector<8x2048xf32> -> vector<8x2048xf32>
    %c1_76 = arith.constant 1 : index
    %c0_77 = arith.constant 0 : index
    %c0_78 = arith.constant 0 : index
    %139 = vector.load %arg8[%c1_76, %c0_77, %c0_78] : memref<2x1x2048xf32, #tpu.memory_space<vmem>>, vector<1x1x2048xf32>
    %140 = vector.shape_cast %139 : vector<1x1x2048xf32> to vector<1x2048xf32>
    %141 = vector.broadcast %140 : vector<1x2048xf32> to vector<8x2048xf32>
    %142 = arith.addf %138, %141 : vector<8x2048xf32>
    %cst_79 = arith.constant 0.000000e+00 : f32
    %143 = vector.broadcast %cst_79 : f32 to vector<8x2048xf32>
    %144 = arith.maximumf %142, %143 : vector<8x2048xf32>
    %145 = arith.truncf %144 : vector<8x2048xf32> to vector<8x2048xbf16>
    %c1_80 = arith.constant 1 : index
    %c0_81 = arith.constant 0 : index
    %c0_82 = arith.constant 0 : index
    %146 = vector.load %arg5[%c1_80, %c0_81, %c0_82] : memref<2x2048x32xbf16, #tpu.memory_space<vmem>>, vector<1x2048x32xbf16>
    %147 = vector.shape_cast %146 : vector<1x2048x32xbf16> to vector<2048x32xbf16>
    %cst_83 = arith.constant dense<0.000000e+00> : vector<8x32xf32>
    %148 = tpu.matmul %145, %147, %cst_83 {dimension_numbers = #tpu.dot_dimension_numbers<[1], [0], [0], [1], [0, 0, 1, 1], [], []>} : vector<8x2048xbf16>, vector<2048x32xbf16>, vector<8x32xf32> -> vector<8x32xf32>
    %149 = vector.broadcast %101 : vector<1x32xf32> to vector<8x32xf32>
    %150 = arith.addf %148, %149 : vector<8x32xf32>
    %151 = arith.addf %134, %150 : vector<8x32xf32>
    %cst_84 = arith.constant dense<0.000000e+00> : vector<8xf32>
    %152 = vector.multi_reduction <add>, %151, %cst_84 [1] : vector<8x32xf32> to vector<8xf32>
    %153 = vector.shape_cast %152 : vector<8xf32> to vector<8x1xf32>
    %cst_85 = arith.constant 3.200000e+01 : f32
    %154 = vector.broadcast %cst_85 : f32 to vector<8x1xf32>
    %155 = arith.divf %153, %154 : vector<8x1xf32>
    %156 = vector.broadcast %155 : vector<8x1xf32> to vector<8x32xf32>
    %157 = arith.subf %151, %156 : vector<8x32xf32>
    %158 = arith.mulf %157, %157 : vector<8x32xf32>
    %cst_86 = arith.constant dense<0.000000e+00> : vector<8xf32>
    %159 = vector.multi_reduction <add>, %158, %cst_86 [1] : vector<8x32xf32> to vector<8xf32>
    %160 = vector.shape_cast %159 : vector<8xf32> to vector<8x1xf32>
    %cst_87 = arith.constant 3.200000e+01 : f32
    %161 = vector.broadcast %cst_87 : f32 to vector<8x1xf32>
    %162 = arith.divf %160, %161 : vector<8x1xf32>
    %163 = vector.broadcast %155 : vector<8x1xf32> to vector<8x32xf32>
    %164 = arith.subf %151, %163 : vector<8x32xf32>
    %cst_88 = arith.constant 9.99999974E-6 : f32
    %165 = vector.broadcast %cst_88 : f32 to vector<8x1xf32>
    %166 = arith.addf %162, %165 : vector<8x1xf32>
    %167 = math.rsqrt %166 : vector<8x1xf32>
    %168 = vector.broadcast %167 : vector<8x1xf32> to vector<8x32xf32>
    %169 = arith.mulf %164, %168 : vector<8x32xf32>
    %170 = vector.broadcast %103 : vector<1x32xf32> to vector<8x32xf32>
    %171 = arith.mulf %169, %170 : vector<8x32xf32>
    %172 = vector.broadcast %105 : vector<1x32xf32> to vector<8x32xf32>
    %173 = arith.addf %171, %172 : vector<8x32xf32>
    %174 = arith.truncf %173 : vector<8x32xf32> to vector<8x32xbf16>
    %c0_89 = arith.constant 0 : index
    %c0_90 = arith.constant 0 : index
    %175 = vector.load %arg6[%c0_89, %c0_90] : memref<32x16xbf16, #tpu.memory_space<vmem>>, vector<32x16xbf16>
    %cst_91 = arith.constant dense<0.000000e+00> : vector<8x16xf32>
    %176 = tpu.matmul %174, %175, %cst_91 {dimension_numbers = #tpu.dot_dimension_numbers<[1], [0], [0], [1], [0, 0, 1, 1], [], []>} : vector<8x32xbf16>, vector<32x16xbf16>, vector<8x16xf32> -> vector<8x16xf32>
    %c0_92 = arith.constant 0 : index
    %c0_93 = arith.constant 0 : index
    %177 = vector.load %arg9[%c0_92, %c0_93] : memref<1x16xf32, #tpu.memory_space<vmem>>, vector<1x16xf32>
    %178 = vector.broadcast %177 : vector<1x16xf32> to vector<8x16xf32>
    %179 = arith.addf %176, %178 : vector<8x16xf32>
    %c0_94 = arith.constant 0 : index
    %c0_95 = arith.constant 0 : index
    %180 = vector.load %arg10[%c0_94, %c0_95] : memref<8x16xf32, #tpu.memory_space<vmem>>, vector<8x16xf32>
    tpu.vector_store %arg10[%c0_94, %c0_95], %179 {strides = array<i32>} : memref<8x16xf32, #tpu.memory_space<vmem>>, vector<8x16xf32>,
    return
  }
  func.func @transform_0(%arg0: i32) -> (i32, i32) {
    %c0_i32 = arith.constant 0 : i32
    %c0_i32_0 = arith.constant 0 : i32
    return %arg0, %c0_i32 : i32, i32
  }
  func.func @transform_1(%arg0: i32) -> (i32, i32) {
    %c0_i32 = arith.constant 0 : i32
    %c0_i32_0 = arith.constant 0 : i32
    %c0_i32_1 = arith.constant 0 : i32
    return %c0_i32, %c0_i32_0 : i32, i32
  }
  func.func @transform_2(%arg0: i32) -> (i32, i32, i32) {
    %c0_i32 = arith.constant 0 : i32
    %c0_i32_0 = arith.constant 0 : i32
    %c0_i32_1 = arith.constant 0 : i32
    %c0_i32_2 = arith.constant 0 : i32
    return %c0_i32, %c0_i32_0, %c0_i32_1 : i32, i32, i32
  }
  func.func @transform_3(%arg0: i32) -> (i32, i32, i32) {
    %c0_i32 = arith.constant 0 : i32
    %c0_i32_0 = arith.constant 0 : i32
    %c0_i32_1 = arith.constant 0 : i32
    %c0_i32_2 = arith.constant 0 : i32
    return %c0_i32, %c0_i32_0, %c0_i32_1 : i32, i32, i32
  }
  func.func @transform_4(%arg0: i32) -> (i32, i32, i32) {
    %c0_i32 = arith.constant 0 : i32
    %c0_i32_0 = arith.constant 0 : i32
    %c0_i32_1 = arith.constant 0 : i32
    %c0_i32_2 = arith.constant 0 : i32
    return %c0_i32, %c0_i32_0, %c0_i32_1 : i32, i32, i32
  }
  func.func @transform_5(%arg0: i32) -> (i32, i32) {
    %c0_i32 = arith.constant 0 : i32
    %c0_i32_0 = arith.constant 0 : i32
    %c0_i32_1 = arith.constant 0 : i32
    return %c0_i32, %c0_i32_0 : i32, i32
  }
  func.func @transform_6(%arg0: i32) -> (i32, i32, i32) {
    %c0_i32 = arith.constant 0 : i32
    %c0_i32_0 = arith.constant 0 : i32
    %c0_i32_1 = arith.constant 0 : i32
    %c0_i32_2 = arith.constant 0 : i32
    return %c0_i32, %c0_i32_0, %c0_i32_1 : i32, i32, i32
  }
  func.func @transform_7(%arg0: i32) -> (i32, i32, i32) {
    %c0_i32 = arith.constant 0 : i32
    %c0_i32_0 = arith.constant 0 : i32
    %c0_i32_1 = arith.constant 0 : i32
    %c0_i32_2 = arith.constant 0 : i32
    return %c0_i32, %c0_i32_0, %c0_i32_1 : i32, i32, i32
  }
  func.func @transform_8(%arg0: i32) -> (i32, i32) {
    %c0_i32 = arith.constant 0 : i32
    %c0_i32_0 = arith.constant 0 : i32
    %c0_i32_1 = arith.constant 0 : i32
    return %c0_i32, %c0_i32_0 : i32, i32
  }
  func.func @transform_9(%arg0: i32) -> (i32, i32) {
    %c0_i32 = arith.constant 0 : i32
    %c0_i32_0 = arith.constant 0 : i32
    return %arg0, %c0_i32 : i32, i32
  }
}

</mosaic_0001>

<bundles_post_ra>
// kernel: tpu_custom_call.1
= control target key start
LH: loop header
LB: loop body
LE: loop exit
PB: predicated region body
PF: predicated region fallthrough
CT: control target
= control target key end

     0   :  { %vm37_vm0 = vcmask 130048   ;;  %s7413_s0 = inlined_call_operand.vmem [shape: f32[8,16], index: 0, kind: input, shape index: {}]   ;;  %s7414_s1 = inlined_call_operand.vmem [shape: f32[16,32], index: 1, kind: input, shape index: {}]   ;;  %s7415_s2 = inlined_call_operand.vmem [shape: bf16[2,32,32], index: 2, kind: input, shape index: {}]   ;;  %s7416_s3 = inlined_call_operand.vmem [shape: bf16[2,32,2048], index: 3, kind: input, shape index: {}]   ;;  %s7417_s4 = inlined_call_operand.vmem [shape: bf16[2,2048,32], index: 4, kind: input, shape index: {}]   ;;  %s7418_s5 = inlined_call_operand.vmem [shape: bf16[32,16], index: 5, kind: input, shape index: {}]   ;;  %s7419_s6 = inlined_call_operand.vmem [shape: f32[2,8,32], index: 6, kind: input, shape index: {}]   ;;  %s7420_s7 = inlined_call_operand.vmem [shape: f32[2,1,2048], index: 7, kind: input, shape index: {}]   ;;  %s7421_s8 = inlined_call_operand.vmem [shape: f32[1,16], index: 8, kind: input, shape index: {}]   ;;  %s7422_s9 = inlined_call_operand.hbm [shape: f32[8,16], index: 9, kind: output, shape index: {}]  }
   0x1   :  { %v36_v0 = vld [vmem:[%s7414_s1 + $0x8] sm:$0xff]  ;;  %v35_v1 = vld [vmem:[%s7414_s1] sm:$0xff] }
   0x2   :  { %v34_v2 = vld [vmem:[%s7413_s0] sm:$0xff]  ;;  %55 = vmatpush.msra.mxu0 %v36_v0 }
   0x4   :  { %56 = vmatpush.msra.mxu0 %v35_v1 }
   0x5   :  { %3887 = vmatmul.msk.f32.vlgmr.msra.gmra.mxu0 %vm37_vm0, %v34_v2 }
   0x6   :  { %14 = vsyncpa [#allocation3], 0  ;;  %v62_v3 = vlaneseq  ;;  %v5531_v5 = vld [vmem:[%s7415_s2 + $0x8] sm:$0xff]  ;;  %v5530_v6 = vld [vmem:[%s7415_s2] sm:$0xff]  ;;  %v5915_v8 = vmov 1.5707964  }
   0x7   :  { %256 = vmatpush.bf16.msra.mxu1 %v5531_v5  ;;  %v5916_v23 = vmov 683565275   ;;  %v5917_v25 = vmov 2475754826   ;;  %v5918_v27 = vmov 2131351028  }
   0x8   :  { %v63_v4 = vand.u32 127, %v62_v3  ;;  %v5919_v29 = vmov 2102212464   ;;  %v5920_v34 = vmov 920167782   ;;  %s5924_s13 = smov [#allocation2]  }
   0x9   :  { %v5921_v37 = vmov 1326507024   ;;  %s3876_s14 = sshll.u32 %s5924_s13, 4  ;;  %s3878_s17 = sshll.u32 %s7422_s9, 4  ;;  %s3877_s14 = int_to_ptr.vmem [resolvable:$true] %s3876_s14  ;;  %s3879_s17 = int_to_ptr.hbm [resolvable:$true] %s3878_s17 }
   0xa   :  { %vm64_vm1 = vcmp.lt.s32.totalorder %v63_v4, 16 }
   0xb   :  { %257 = vmatpush.bf16.msra.mxu1 %v5530_v6  ;;  %v65_v9 = vsel %vm64_vm1, 0.0, %v5915_v8 }
  0x82   :  { %v58_v7 = vpop.f32.mrf.mxu0 }
  0x83   :  { %v61_v10 = vmul.f32 6.2831855, %v58_v7 }
  0x85   :  { %v5991_v11 = vadd.f32 %v65_v9, %v61_v10  ;;  %v5922_v9 = vmov 0  }
  0x87   :  { %v70_v12 = vand.u32 2139095040, %v5991_v11  ;;  %v67_v14 = vand.u32 2147483647, %v5991_v11  ;;  %vm69_vm14 = vcmp.lt.s32.totalorder %v5991_v11, 0 }
  0x89   :  { %v71_v13 = vshrl.u32 %v70_v12, 23  ;;  %v74_v17 = vand.u32 8388607, %v67_v14  ;;  %vm68_vm15 = vcmp.le.f32.partialorder %v67_v14, 0.7853982 }
  0x8b   :  { %v3888_v15 = vadd.s32 4294967169, %v71_v13  ;;  %v75_v20 = vor.u32 8388608, %v74_v17 }
  0x8d   :  { %v77_v16 = vadd.s32 1, %v3888_v15  ;;  %v6006_v39 = vshll.u32 %v75_v20, 8 }
  0x8f   :  { %vm78_vm2 = vcmp.gt.s32.totalorder %v77_v16, 0  ;;  %v116_v51 = vand.u32 65535, %v6006_v39  ;;  %v117_v53 = vshrl.u32 %v6006_v39, 16 }
  0x90   :  { %v79_v18 = vsel %vm78_vm2, %v77_v16, 0 }
  0x91   :  { %v81_v19 = vand.u32 31, %v79_v18  ;;  %v5997_v21 = vshrl.u32 %v79_v18, 5 }
  0x93   :  { %v5999_v22 = vsub.s32 32, %v81_v19  ;;  %v84_v24 = vshll.u32 %v5916_v23, %v81_v19  ;;  %v87_v26 = vshll.u32 %v5917_v25, %v81_v19  ;;  %v90_v28 = vshll.u32 %v5918_v27, %v81_v19 }
  0x94   :  { %v93_v30 = vshll.u32 %v5919_v29, %v81_v19  ;;  %v96_v36 = vshll.u32 %v5920_v34, %v81_v19  ;;  %vm99_vm3 = vcmp.lt.s32.totalorder %v5997_v21, 1  ;;  %vm102_vm4 = vcmp.lt.s32.totalorder %v5997_v21, 4 }
  0x95   :  { %v85_v31 = vshrl.u32 %v5917_v25, %v5999_v22  ;;  %v88_v32 = vshrl.u32 %v5918_v27, %v5999_v22  ;;  %v91_v33 = vshrl.u32 %v5919_v29, %v5999_v22  ;;  %v94_v35 = vshrl.u32 %v5920_v34, %v5999_v22 }
  0x96   :  { %v97_v38 = vshrl.u32 %v5921_v37, %v5999_v22  ;;  %vm101_vm5 = vcmp.lt.s32.totalorder %v5997_v21, 3  ;;  %vm100_vm6 = vcmp.lt.s32.totalorder %v5997_v21, 2  ;;  %v83_v16 = vshrl.u32 %v5916_v23, %v5999_v22 }
  0x97   :  { %v86_v40 = vor.u32 %v85_v31, %v84_v24  ;;  %v89_v41 = vor.u32 %v88_v32, %v87_v26  ;;  %v92_v42 = vor.u32 %v91_v33, %v90_v28  ;;  %v95_v43 = vor.u32 %v94_v35, %v93_v30 }
  0x98   :  { %v98_v44 = vor.u32 %v97_v38, %v96_v36 }
  0x99   :  { %v107_v45 = vsel %vm99_vm3, %v86_v40, %v89_v41  ;;  %v108_v46 = vsel %vm102_vm4, %v95_v43, 920167782  ;;  %v111_v47 = vsel %vm99_vm3, %v89_v41, %v92_v42  ;;  %v104_v12 = vsel %vm102_vm4, %v92_v42, 2102212464 }
  0x9a   :  { %v109_v48 = vsel %vm101_vm5, %v92_v42, %v108_v46  ;;  %v112_v49 = vsel %vm102_vm4, %v98_v44, 1326507024  ;;  %v103_v25 = vsel %vm99_vm3, %v83_v16, %v86_v40  ;;  %v105_v26 = vsel %vm101_vm5, %v89_v41, %v104_v12 }
  0x9b   :  { %v113_v50 = vsel %vm101_vm5, %v95_v43, %v112_v49  ;;  %v110_v52 = vsel %vm100_vm6, %v107_v45, %v109_v48  ;;  %v106_v22 = vsel %vm100_vm6, %v103_v25, %v105_v26  ;;  %vm210_vm4 = vweird.f32 %v5991_v11 }
  0x9c   :  { %v114_v54 = vsel %vm100_vm6, %v111_v47, %v113_v50  ;;  %v140_v55 = vand.u32 65535, %v110_v52  ;;  %v141_v56 = vshrl.u32 %v110_v52, 16  ;;  %v160_v36 = vmul.u32 %v6006_v39, %v106_v22 }
  0x9d   :  { %v118_v57 = vand.u32 65535, %v114_v54  ;;  %v119_v58 = vshrl.u32 %v114_v54, 16  ;;  %vm246_vm5 = vcmask 261120  }
  0x9e   :  { %v143_v59 = vmul.u32 %v141_v56, %v116_v51  ;;  %v144_v60 = vmul.u32 %v140_v55, %v117_v53  ;;  %v142_v63 = vmul.u32 %v140_v55, %v116_v51  ;;  %v145_v3 = vmul.u32 %v141_v56, %v117_v53 }
  0x9f   :  { %v121_v61 = vmul.u32 %v119_v58, %v116_v51  ;;  %v122_v62 = vmul.u32 %v118_v57, %v117_v53  ;;  %v120_v1 = vmul.u32 %v118_v57, %v116_v51  ;;  %v123_v4 = vmul.u32 %v119_v58, %v117_v53 }
  0xa0   :  { %v146_v0 = vshll.u32 %v143_v59, 16  ;;  %v148_v5 = vshll.u32 %v144_v60, 16  ;;  %v147_v20 = vshrl.u32 %v143_v59, 16  ;;  %v149_v29 = vshrl.u32 %v144_v60, 16 }
  0xa1   :  { %v124_v2 = vshll.u32 %v121_v61, 16  ;;  %v126_v7 = vshll.u32 %v122_v62, 16  ;;  %v125_v27 = vshrl.u32 %v121_v61, 16  ;;  %v127_v31 = vshrl.u32 %v122_v62, 16 }
  0xa2   :  { %vm150_vm7 = vc.u32 %v142_v63, %v146_v0  ;;  %v152_v6 = vadd.s32 %v146_v0, %v142_v63 }
  0xa3   :  { %vm128_vm8 = vc.u32 %v120_v1, %v124_v2  ;;  %v130_v8 = vadd.s32 %v124_v2, %v120_v1  ;;  %v151_v10 = vsel %vm150_vm7, 1, %v5922_v9 }
  0xa4   :  { %v129_v13 = vsel %vm128_vm8, 1, %v5922_v9  ;;  %v153_v15 = vadd.s32 %v151_v10, %v145_v3  ;;  %vm154_vm9 = vc.u32 %v152_v6, %v148_v5  ;;  %v156_v34 = vadd.s32 %v152_v6, %v148_v5 }
  0xa5   :  { %v131_v17 = vadd.s32 %v129_v13, %v123_v4  ;;  %vm132_vm10 = vc.u32 %v130_v8, %v126_v7  ;;  %v155_v18 = vsel %vm154_vm9, 1, %v5922_v9 }
  0xa6   :  { %v133_v19 = vsel %vm132_vm10, 1, %v5922_v9  ;;  %v157_v24 = vadd.s32 %v155_v18, %v153_v15 }
  0xa7   :  { %v135_v28 = vadd.s32 %v133_v19, %v131_v17 }
  0xa8   :  { %v158_v30 = vadd.s32 %v157_v24, %v147_v20 }
  0xa9   :  { %v136_v32 = vadd.s32 %v135_v28, %v125_v27  ;;  %v5866_v28 = vld [vmem:[%s7419_s6] ss:$0 sm:$0xff] }
  0xaa   :  { %v159_v23 = vadd.s32 %v158_v30, %v149_v29 }
  0xab   :  { %v137_v33 = vadd.s32 %v136_v32, %v127_v31 }
  0xac   :  { %v163_v35 = vadd.s32 1, %v159_v23 }
  0xad   :  { %vm162_vm11 = vc.u32 %v137_v33, %v156_v34  ;;  %v161_v48 = vadd.s32 %v156_v34, %v137_v33 }
  0xae   :  { %v164_v37 = vsel %vm162_vm11, %v163_v35, %v159_v23  ;;  %v5923_v23 = vmov 32.0  }
  0xaf   :  { %v165_v38 = vadd.s32 %v164_v37, %v160_v36  ;;  %5879 = vrcp.f32 %v5923_v23 }
  0xb1   :  { %v166_v40 = vadd.s32 536870912, %v165_v38 }
  0xb3   :  { %v167_v41 = vshrl.u32 %v166_v40, 30 }
  0xb5   :  { %v168_v42 = vshll.u32 %v167_v41, 30  ;;  %v191_v61 = vsub.s32 4, %v167_v41 }
  0xb7   :  { %v169_v43 = vsub.s32 %v165_v38, %v168_v42  ;;  %v192_v2 = vsel %vm69_vm14, %v191_v61, %v167_v41 }
  0xb8   :  { %v194_v5 = vsel %vm68_vm15, 0, %v192_v2 }
  0xb9   :  { %vm170_vm12 = vcmp.lt.s32.totalorder %v169_v43, 0  ;;  %v171_v44 = vsub.s32 0, %v169_v43  ;;  %v211_v10 = vadd.s32 3, %v194_v5  ;;  %v5550_v5 = vld [vmem:[%s7416_s3 + $0x94] sm:$0xf] }
  0xbb   :  { %v172_v45 = vsel %vm170_vm12, %v171_v44, %v169_v43  ;;  %v212_v16 = vand.u32 3, %v211_v10  ;;  %v3966_v44 = vld [vmem:[%s7416_s3 + $0x80] sm:$0xf]  ;;  %v5559_v10 = vld [vmem:[%s7416_s3 + $0xd4] sm:$0xf0] }
  0xbc   :  { %v173_v46 = vclz %v172_v45  ;;  %v5556_v45 = vld [vmem:[%s7416_s3 + $0xbc] sm:$0xf0] }
  0xbd   :  { %vm214_vm1 = vcmp.eq.s32.totalorder %v212_v16, 0  ;;  %vm217_vm2 = vcmp.eq.s32.totalorder %v212_v16, 2  ;;  %vm213_vm3 = vcmp.lt.s32.totalorder %v212_v16, 2  ;;  %v3918_v16 = vld [vmem:[%s7416_s3 + $0x10] sm:$0xf] }
  0xbe   :  { %v3889_v47 = vadd.s32 4294967294, %v173_v46  ;;  %v5548_v46 = vld [vmem:[%s7416_s3 + $0x84] sm:$0xf] }
  0xc0   :  { %vm3890_vm13 = vcmp.lt.s32.totalorder %v3889_v47, 0 }
  0xc1   :  { %v176_v21 = vsel %vm3890_vm13, 0, %v3889_v47  ;;  %v3967_v47 = vor.u32 %v5556_v45, %v3966_v44  ;;  %v3998_v44 = vld [vmem:[%s7416_s3 + $0xa0] sm:$0xf] }
  0xc2   :  { %v177_v49 = vsub.s32 32, %v176_v21  ;;  %v181_v50 = vsub.s32 4294967266, %v176_v21  ;;  %v178_v51 = vshll.u32 %v169_v43, %v176_v21  ;;  %v3968_v21 = vld [vmem:[%s7416_s3 + $0xc0] sm:$0xf0]  ;;  %v5560_v45 = vld [vmem:[%s7416_s3 + $0xdc] sm:$0xf0] }
  0xc3   :  { %535 = vmatpush.bf16.msra.mxu2 %v3967_v47  ;;  %v4000_v47 = vld [vmem:[%s7416_s3 + $0xe0] sm:$0xf0] }
  0xc4   :  { %v179_v52 = vshrl.u32 %v161_v48, %v177_v49  ;;  %v182_v39 = vadd.s32 127, %v181_v50  ;;  %v3974_v48 = vld [vmem:[%s7416_s3 + $0x88] sm:$0xf]  ;;  %v3971_v50 = vor.u32 %v5548_v46, %v3968_v21  ;;  %v5552_v46 = vld [vmem:[%s7416_s3 + $0xa4] sm:$0xf] }
  0xc5   :  { %v5557_v49 = vld [vmem:[%s7416_s3 + $0xc4] sm:$0xf0] }
  0xc6   :  { %v180_v53 = vor.u32 %v179_v52, %v178_v51  ;;  %v183_v54 = vshll.u32 %v182_v39, 23  ;;  %v3975_v51 = vor.u32 %v5557_v49, %v3974_v48  ;;  %v5549_v52 = vld [vmem:[%s7416_s3 + $0x8c] sm:$0xf]  ;;  %548 = vmatpush.bf16.msra.mxu3 %v3971_v50  ;;  %v5561_v48 = vld [vmem:[%s7416_s3 + $0xe4] sm:$0xf0] }
  0xc7   :  { %v3976_v39 = vld [vmem:[%s7416_s3 + $0xc8] sm:$0xf0] }
  0xc8   :  { %v184_v55 = vor.u32 4788187, %v183_v54  ;;  %v187_v57 = vcvt.s32.f32 %v180_v53  ;;  %v3979_v53 = vor.u32 %v5549_v52, %v3976_v39  ;;  %561 = vmatpush.bf16.msrb.mxu0 %v3975_v51  ;;  %v3902_v54 = vld [vmem:[%s7416_s3] sm:$0xf]  ;;  %v5553_v49 = vld [vmem:[%s7416_s3 + $0xac] sm:$0xf]  ;;  %v3999_v52 = vor.u32 %v5560_v45, %v3998_v44 }
  0xc9   :  { %v4008_v50 = vld [vmem:[%s7416_s3 + $0xe8] sm:$0xf0]  ;;  %v4003_v39 = vor.u32 %v5552_v46, %v4000_v47  ;;  %v5592_v44 = vld [vmem:[%s7417_s4 + $0xe0] sm:$0xff]  ;;  %v5583_v47 = vld [vmem:[%s7417_s4 + $0x98] sm:$0xff] }
  0xca   :  { %v185_v56 = vand.u32 2147483647, %v184_v55  ;;  %v5540_v55 = vld [vmem:[%s7416_s3 + $0x3c] sm:$0xf0]  ;;  %574 = vmatpush.bf16.msrb.mxu1 %v3979_v53 }
  0xcb   :  { %v3934_v53 = vld [vmem:[%s7416_s3 + $0x20] sm:$0xf] }
  0xcc   :  { %v188_v58 = vmul.f32 %v187_v57, %v185_v56  ;;  %v5532_v56 = vld [vmem:[%s7416_s3 + $0x4] sm:$0xf]  ;;  %v3903_v57 = vor.u32 %v5540_v55, %v3902_v54  ;;  %v5544_v54 = vld [vmem:[%s7416_s3 + $0x5c] sm:$0xf0] }
  0xcd   :  { %v5568_v45 = vld [vmem:[%s7417_s4 + $0x20] sm:$0xff] }
  0xce   :  { %v189_v59 = vxor.u32 2147483648, %v188_v58  ;;  %536 = vmatpush.bf16.msra.mxu2 %v3903_v57  ;;  %v5536_v57 = vld [vmem:[%s7416_s3 + $0x24] sm:$0xf] }
  0xcf   :  { %v5576_v46 = vld [vmem:[%s7417_s4 + $0x60] sm:$0xff] }
  0xd0   :  { %v190_v60 = vsel %vm69_vm14, %v189_v59, %v188_v58  ;;  %v3904_v58 = vld [vmem:[%s7416_s3 + $0x40] sm:$0xf0]  ;;  %v3910_v59 = vld [vmem:[%s7416_s3 + $0x8] sm:$0xf] }
  0xd1   :  { %v193_v62 = vsel %vm68_vm15, %v5991_v11, %v190_v60  ;;  %v5880_v11 = vpop.eup %5879  ;;  %v5541_v60 = vld [vmem:[%s7416_s3 + $0x44] sm:$0xf0]  ;;  %v3907_v61 = vor.u32 %v5532_v56, %v3904_v58  ;;  %v4011_v56 = vor.u32 %v5553_v49, %v4008_v50  ;;  %v3936_v58 = vld [vmem:[%s7416_s3 + $0x60] sm:$0xf0]  ;;  %v5575_v49 = vld [vmem:[%s7417_s4 + $0x58] sm:$0xff] }
  0xd2   :  { %v195_v63 = vmul.f32 %v193_v62, %v193_v62  ;;  %v268_v33 = vmul.f32 32.0, %v5880_v11  ;;  %vm272_vm6 = vweird.f32 %v5880_v11  ;;  %v5582_v50 = vld [vmem:[%s7417_s4 + $0x90] sm:$0xff] }
  0xd3   :  { %549 = vmatpush.bf16.msra.mxu3 %v3907_v61  ;;  %v5537_v61 = vld [vmem:[%s7416_s3 + $0x2c] sm:$0xf] }
  0xd4   :  { %v196_v0 = vmul.f32 -0.001358992, %v195_v63  ;;  %v203_v1 = vmul.f32 -0.00019511016, %v195_v63  ;;  %v269_v34 = vsub.f32 1.0, %v268_v33 }
  0xd6   :  { %v197_v3 = vadd.f32 0.041655596, %v196_v0  ;;  %v204_v4 = vadd.f32 0.008332121, %v203_v1  ;;  %v270_v35 = vmul.f32 %v5880_v11, %v269_v34  ;;  %v3912_v0 = vld [vmem:[%s7416_s3 + $0x48] sm:$0xf0] }
  0xd8   :  { %v198_v6 = vmul.f32 %v197_v3, %v195_v63  ;;  %v205_v7 = vmul.f32 %v204_v4, %v195_v63  ;;  %v271_v36 = vadd.f32 %v5880_v11, %v270_v35  ;;  %v3982_v3 = vld [vmem:[%s7416_s3 + $0x90] sm:$0xf] }
  0xd9   :  { %v5558_v4 = vld [vmem:[%s7416_s3 + $0xcc] sm:$0xf0] }
  0xda   :  { %v199_v8 = vadd.f32 -0.4999988, %v198_v6  ;;  %v206_v9 = vadd.f32 -0.16666654, %v205_v7  ;;  %v6050_v37 = vsel %vm272_vm6, %v5880_v11, %v271_v36  ;;  %v3983_v7 = vor.u32 %v5558_v4, %v3982_v3  ;;  %v5867_v36 = vld [vmem:[%s7419_s6 + $0x1] ss:$0 sm:$0xff] }
  0xdb   :  { %v4014_v3 = vld [vmem:[%s7416_s3 + $0xb0] sm:$0xf] }
  0xdc   :  { %v200_v12 = vmul.f32 %v199_v8, %v195_v63  ;;  %v207_v13 = vmul.f32 %v206_v9, %v195_v63  ;;  %v5533_v63 = vld [vmem:[%s7416_s3 + $0xc] sm:$0xf]  ;;  %v3984_v8 = vld [vmem:[%s7416_s3 + $0xd0] sm:$0xf0]  ;;  %v3990_v9 = vld [vmem:[%s7416_s3 + $0x98] sm:$0xf]  ;;  %587 = vmatpush.bf16.msrb.mxu2 %v3983_v7 }
  0xdd   :  { %v3915_v1 = vor.u32 %v5533_v63, %v3912_v0  ;;  %v3935_v63 = vor.u32 %v5544_v54, %v3934_v53  ;;  %v3939_v0 = vor.u32 %v5536_v57, %v3936_v58  ;;  %v5562_v4 = vld [vmem:[%s7416_s3 + $0xec] sm:$0xf0]  ;;  %v4022_v7 = vld [vmem:[%s7416_s3 + $0xb8] sm:$0xf]  ;;  %v5581_v53 = vld [vmem:[%s7417_s4 + $0x88] sm:$0xff] }
  0xde   :  { %v201_v15 = vadd.f32 1.0, %v200_v12  ;;  %v208_v14 = vadd.f32 1.0, %v207_v13  ;;  %v3987_v12 = vor.u32 %v5550_v5, %v3984_v8  ;;  %v3991_v13 = vor.u32 %v5559_v10, %v3990_v9  ;;  %v5554_v5 = vld [vmem:[%s7416_s3 + $0xb4] sm:$0xf]  ;;  %v5563_v8 = vld [vmem:[%s7416_s3 + $0xf4] sm:$0xf0] }
  0xdf   :  { %575 = vmatpush.bf16.msrb.mxu1 %v3915_v1  ;;  %v5555_v9 = vld [vmem:[%s7416_s3 + $0xbc] sm:$0xf]  ;;  %v5589_v54 = vld [vmem:[%s7417_s4 + $0xc8] sm:$0xff]  ;;  %v5580_v57 = vld [vmem:[%s7417_s4 + $0x80] sm:$0xff] }
  0xe0   :  { %v209_v17 = vmul.f32 %v208_v14, %v193_v62  ;;  %v218_v18 = vxor.u32 2147483648, %v201_v15  ;;  %v3911_v62 = vor.u32 %v5541_v60, %v3910_v59  ;;  %v3992_v14 = vld [vmem:[%s7416_s3 + $0xd8] sm:$0xf0]  ;;  %600 = vmatpush.bf16.msrb.mxu3 %v3987_v12  ;;  %v3942_v59 = vld [vmem:[%s7416_s3 + $0x28] sm:$0xf]  ;;  %v4015_v12 = vor.u32 %v5562_v4, %v4014_v3  ;;  %v5588_v58 = vld [vmem:[%s7417_s4 + $0xc0] sm:$0xff] }
  0xe1   :  { %v5545_v60 = vld [vmem:[%s7416_s3 + $0x64] sm:$0xf0]  ;;  %v4024_v10 = vld [vmem:[%s7416_s3 + $0xf8] sm:$0xf0]  ;;  %v5602_v3 = vld [vmem:[%s7417_s4 + $0x130] sm:$0xff] }
  0xe2   :  { %v215_v19 = vxor.u32 2147483648, %v209_v17  ;;  %v219_v24 = vsel %vm217_vm2, %v218_v18, %v209_v17  ;;  %562 = vmatpush.bf16.msrb.mxu0 %v3911_v62  ;;  %v3944_v62 = vld [vmem:[%s7416_s3 + $0x68] sm:$0xf0]  ;;  %v3943_v1 = vor.u32 %v5545_v60, %v3942_v59  ;;  %v5619_v59 = vld [vmem:[%s7417_s4 + $0x1b8] sm:$0xff]  ;;  %v5610_v4 = vld [vmem:[%s7417_s4 + $0x170] sm:$0xff] }
  0xe3   :  { %v5627_v60 = vld [vmem:[%s7417_s4 + $0x1f8] sm:$0xff] }
  0xe4   :  { %v216_v20 = vsel %vm214_vm1, %v201_v15, %v215_v19  ;;  %v5551_v15 = vld [vmem:[%s7416_s3 + $0x9c] sm:$0xf]  ;;  %v5542_v19 = vld [vmem:[%s7416_s3 + $0x4c] sm:$0xf0] }
  0xe5   :  { %v220_v25 = vsel %vm213_vm3, %v216_v20, %v219_v24  ;;  %v3995_v18 = vor.u32 %v5551_v15, %v3992_v14  ;;  %v5534_v20 = vld [vmem:[%s7416_s3 + $0x14] sm:$0xf]  ;;  %v3919_v24 = vor.u32 %v5542_v19, %v3918_v16  ;;  %v3950_v15 = vld [vmem:[%s7416_s3 + $0x30] sm:$0xf]  ;;  %v4023_v16 = vor.u32 %v5563_v8, %v4022_v7  ;;  %v5601_v7 = vld [vmem:[%s7417_s4 + $0x128] sm:$0xff] }
  0xe6   :  { %v221_v26 = vsel %vm210_vm4, nan, %v220_v25  ;;  %613 = vmatpush.bf16.msra.mxu0 %v3991_v13  ;;  %v3920_v25 = vld [vmem:[%s7416_s3 + $0x50] sm:$0xf0]  ;;  %v5546_v14 = vld [vmem:[%s7416_s3 + $0x6c] sm:$0xf0]  ;;  %v5609_v8 = vld [vmem:[%s7417_s4 + $0x168] sm:$0xff] }
  0xe7   :  { %v228_v27 = vpack.c.bf16 %v221_v26, %v221_v26  ;;  %588 = vmatpush.bf16.msrb.mxu2 %v3919_v24  ;;  %v3952_v19 = vld [vmem:[%s7416_s3 + $0x70] sm:$0xf0]  ;;  %v5547_v24 = vld [vmem:[%s7416_s3 + $0x74] sm:$0xf0] }
  0xe9   :  { %3899 = vmatmul.msk.bf16.vlgmr.msra.gmra.mxu1 %vm246_vm5, %v228_v27  ;;  %v5543_v27 = vld [vmem:[%s7416_s3 + $0x54] sm:$0xf0] }
  0xea   :  { %626 = vmatpush.bf16.msra.mxu1 %v3995_v18  ;;  %v5538_v18 = vld [vmem:[%s7416_s3 + $0x34] sm:$0xf] }
 0x166   :  { %v259_v29 = vpop.f32.mrf.mxu1 }
 0x167   :  { %v260_v30 = vadd.f32 %v5866_v28, %v259_v29  ;;  %v3923_v28 = vor.u32 %v5534_v20, %v3920_v25  ;;  %v3958_v20 = vld [vmem:[%s7416_s3 + $0x38] sm:$0xf]  ;;  %v5539_v25 = vld [vmem:[%s7416_s3 + $0x3c] sm:$0xf] }
 0x169   :  { %v263_v31 = vadd.f32 %v260_v30, %v221_v26  ;;  %v3926_v26 = vld [vmem:[%s7416_s3 + $0x18] sm:$0xf]  ;;  %v5535_v30 = vld [vmem:[%s7416_s3 + $0x1c] sm:$0xf]  ;;  %601 = vmatpush.bf16.msrb.mxu3 %v3923_v28  ;;  %v3955_v28 = vor.u32 %v5538_v18, %v3952_v19 }
 0x16a   :  { %v3927_v29 = vor.u32 %v5543_v27, %v3926_v26  ;;  %v3960_v26 = vld [vmem:[%s7416_s3 + $0x78] sm:$0xf0]  ;;  %v3951_v27 = vor.u32 %v5546_v14, %v3950_v15 }
 0x16b   :  { %v264_v32 = vsel %vm246_vm5, %v263_v31, 0.0  ;;  %v5615_v15 = vld [vmem:[%s7417_s4 + $0x198] sm:$0xff] }
 0x16c   :  { %265 = vadd.xlane.f32.xlu0 %v264_v32  ;;  %614 = vmatpush.bf16.msra.mxu0 %v3927_v29  ;;  %v3959_v29 = vor.u32 %v5547_v24, %v3958_v20  ;;  %v5623_v14 = vld [vmem:[%s7417_s4 + $0x1d8] sm:$0xff]  ;;  %v5613_v20 = vld [vmem:[%s7417_s4 + $0x188] sm:$0xff] }
 0x16d   :  { %v5599_v18 = vld [vmem:[%s7417_s4 + $0x118] sm:$0xff]  ;;  %v5621_v24 = vld [vmem:[%s7417_s4 + $0x1c8] sm:$0xff] }
 0x16e   :  { %v261_v22 = vpop.f32.mrf.mxu1  ;;  %v5607_v19 = vld [vmem:[%s7417_s4 + $0x158] sm:$0xff] }
 0x1df   :  { %v266_v38 = vpop.xlane.xlu0 %265 }
 0x1e0   :  { %v274_v40 = vmul.f32 %v6050_v37, %v266_v38 }
 0x1e2   :  { %v6053_v41 = vsub.f32 %v263_v31, %v274_v40  ;;  %v3928_v31 = vld [vmem:[%s7416_s3 + $0x58] sm:$0xf0]  ;;  %v5868_v40 = vld [vmem:[%s7419_s6 + $0x2] ss:$0 sm:$0xff] }
 0x1e3   :  { %v3931_v32 = vor.u32 %v5535_v30, %v3928_v31  ;;  %v3963_v30 = vor.u32 %v5539_v25, %v3960_v26  ;;  %v5587_v31 = vld [vmem:[%s7417_s4 + $0xb8] sm:$0xff]  ;;  %v5598_v25 = vld [vmem:[%s7417_s4 + $0x110] sm:$0xff] }
 0x1e4   :  { %v276_v42 = vmul.f32 %v6053_v41, %v6053_v41  ;;  %v5606_v26 = vld [vmem:[%s7417_s4 + $0x150] sm:$0xff] }
 0x1e5   :  { %627 = vmatpush.bf16.msra.mxu1 %v3931_v32  ;;  %v5595_v32 = vld [vmem:[%s7417_s4 + $0xf8] sm:$0xff] }
 0x1e6   :  { %v277_v43 = vsel %vm246_vm5, %v276_v42, 0.0 }
 0x1e7   :  { %278 = vadd.xlane.f32.xlu0 %v277_v43 }
 0x25a   :  { %v279_v2 = vpop.xlane.xlu0 %278 }
 0x25b   :  { %v280_v6 = vmul.f32 %v279_v2, %v6050_v37  ;;  %v3947_v2 = vor.u32 %v5537_v61, %v3944_v62  ;;  %v5564_v61 = vld [vmem:[%s7417_s4] sm:$0xff] }
 0x25c   :  { %v5572_v62 = vld [vmem:[%s7417_s4 + $0x40] sm:$0xff] }
 0x25d   :  { %v281_v17 = vadd.f32 1e-05, %v280_v6  ;;  %v4016_v6 = vld [vmem:[%s7416_s3 + $0xf0] sm:$0xf0] }
 0x25e   :  { %v4019_v13 = vor.u32 %v5554_v5, %v4016_v6  ;;  %v5617_v5 = vld [vmem:[%s7417_s4 + $0x1a8] sm:$0xff] }
 0x25f   :  { %5881 = vrsqrt.f32 %v281_v17  ;;  %vm288_vm8 = vweird.f32 %v281_v17  ;;  %v5625_v6 = vld [vmem:[%s7417_s4 + $0x1e8] sm:$0xff] }
 0x265   :  { %v5882_v22 = vpop.eup %5881 }
 0x266   :  { %v283_v23 = vmul.f32 %v5882_v22, %v281_v17  ;;  %vm289_vm7 = vweird.f32 %v5882_v22  ;;  %v4027_v17 = vor.u32 %v5555_v9, %v4024_v10  ;;  %v5616_v9 = vld [vmem:[%s7417_s4 + $0x1a0] sm:$0xff] }
 0x267   :  { %vm290_vm9 = vmor %vm288_vm8, %vm289_vm7  ;;  %v5624_v10 = vld [vmem:[%s7417_s4 + $0x1e0] sm:$0xff] }
 0x268   :  { %v284_v11 = vmul.f32 %v5882_v22, %v283_v23  ;;  %v5579_v23 = vld [vmem:[%s7417_s4 + $0x78] sm:$0xff] }
 0x26a   :  { %v285_v33 = vmul.f32 0.5, %v284_v11  ;;  %v5586_v11 = vld [vmem:[%s7417_s4 + $0xb0] sm:$0xff] }
 0x26c   :  { %v286_v34 = vsub.f32 1.5, %v285_v33  ;;  %v5594_v33 = vld [vmem:[%s7417_s4 + $0xf0] sm:$0xff] }
 0x26e   :  { %v287_v35 = vmul.f32 %v5882_v22, %v286_v34  ;;  %v5570_v34 = vld [vmem:[%s7417_s4 + $0x30] sm:$0xff] }
 0x270   :  { %v291_v38 = vsel %vm290_vm9, %v5882_v22, %v287_v35  ;;  %v5571_v22 = vld [vmem:[%s7417_s4 + $0x38] sm:$0xff]  ;;  %v5578_v35 = vld [vmem:[%s7417_s4 + $0x70] sm:$0xff] }
 0x271   :  { %v292_v42 = vmul.f32 %v291_v38, %v6053_v41  ;;  %v4006_v41 = vld [vmem:[%s7416_s3 + $0xa8] sm:$0xf] }
 0x272   :  { %v4007_v55 = vor.u32 %v5561_v48, %v4006_v41  ;;  %v5593_v38 = vld [vmem:[%s7417_s4 + $0xe8] sm:$0xff]  ;;  %v5591_v41 = vld [vmem:[%s7417_s4 + $0xd8] sm:$0xff] }
 0x273   :  { %v294_v43 = vmul.f32 %v5867_v36, %v292_v42  ;;  %v5585_v36 = vld [vmem:[%s7417_s4 + $0xa8] sm:$0xff]  ;;  %v5567_v48 = vld [vmem:[%s7417_s4 + $0x18] sm:$0xff] }
 0x274   :  { %v5577_v42 = vld [vmem:[%s7417_s4 + $0x68] sm:$0xff] }
 0x275   :  { %v6177_v21 = vadd.f32 %v5868_v40, %v294_v43  ;;  %v5569_v40 = vld [vmem:[%s7417_s4 + $0x28] sm:$0xff]  ;;  %v5584_v43 = vld [vmem:[%s7417_s4 + $0xa0] sm:$0xff] }
 0x277   :  { %v6190_v51 = vpack.c.bf16 %v6177_v21, %v6177_v21 }
 0x279   :  { %4028 = vmatmul.msk.bf16.vlgmr.msra.gmra.mxu2 %vm246_vm5, %v6190_v51  ;;  %4029 = vmatmul.msk.bf16.vlgmr.msra.gmra.mxu3 %vm246_vm5, %v6190_v51 }
 0x27a   :  { %4030 = vmatmul.msk.bf16.vlgmr.msrb.gmra.mxu0 %vm246_vm5, %v6190_v51  ;;  %4031 = vmatmul.msk.bf16.vlgmr.msrb.gmra.mxu1 %vm246_vm5, %v6190_v51 }
 0x27b   :  { %639 = vmatpush.bf16.msra.mxu2 %v3999_v52  ;;  %652 = vmatpush.bf16.msra.mxu3 %v4003_v39  ;;  %v5590_v52 = vld [vmem:[%s7417_s4 + $0xd0] sm:$0xff] }
 0x27c   :  { %665 = vmatpush.bf16.msrb.mxu0 %v4007_v55  ;;  %678 = vmatpush.bf16.msrb.mxu1 %v4011_v56  ;;  %v5566_v39 = vld [vmem:[%s7417_s4 + $0x10] sm:$0xff]  ;;  %v5565_v55 = vld [vmem:[%s7417_s4 + $0x8] sm:$0xff] }
 0x27d   :  { %v5573_v56 = vld [vmem:[%s7417_s4 + $0x48] sm:$0xff] }
 0x27f   :  { %640 = vmatpush.bf16.msra.mxu2 %v3935_v63  ;;  %653 = vmatpush.bf16.msra.mxu3 %v3939_v0  ;;  %v5603_v63 = vld [vmem:[%s7417_s4 + $0x138] sm:$0xff] }
 0x280   :  { %666 = vmatpush.bf16.msrb.mxu0 %v3943_v1  ;;  %679 = vmatpush.bf16.msrb.mxu1 %v3947_v2  ;;  %v5611_v0 = vld [vmem:[%s7417_s4 + $0x178] sm:$0xff]  ;;  %v5618_v1 = vld [vmem:[%s7417_s4 + $0x1b0] sm:$0xff] }
 0x281   :  { %v5626_v2 = vld [vmem:[%s7417_s4 + $0x1f0] sm:$0xff] }
 0x289   :  { %4032 = vmatmul.msk.bf16.vlgmr.msrb.gmra.mxu2 %vm246_vm5, %v6190_v51  ;;  %4033 = vmatmul.msk.bf16.vlgmr.msrb.gmra.mxu3 %vm246_vm5, %v6190_v51 }
 0x28a   :  { %4034 = vmatmul.msk.bf16.vlgmr.msra.gmra.mxu0 %vm246_vm5, %v6190_v51  ;;  %4035 = vmatmul.msk.bf16.vlgmr.msra.gmra.mxu1 %vm246_vm5, %v6190_v51 }
 0x28b   :  { %691 = vmatpush.bf16.msrb.mxu2 %v4015_v12  ;;  %704 = vmatpush.bf16.msrb.mxu3 %v4019_v13  ;;  %v5600_v12 = vld [vmem:[%s7417_s4 + $0x120] sm:$0xff] }
 0x28c   :  { %717 = vmatpush.bf16.msra.mxu0 %v4023_v16  ;;  %730 = vmatpush.bf16.msra.mxu1 %v4027_v17  ;;  %v5608_v13 = vld [vmem:[%s7417_s4 + $0x160] sm:$0xff]  ;;  %v5614_v16 = vld [vmem:[%s7417_s4 + $0x190] sm:$0xff] }
 0x28d   :  { %v5622_v17 = vld [vmem:[%s7417_s4 + $0x1d0] sm:$0xff] }
 0x28f   :  { %692 = vmatpush.bf16.msrb.mxu2 %v3951_v27  ;;  %705 = vmatpush.bf16.msrb.mxu3 %v3955_v28  ;;  %v5612_v27 = vld [vmem:[%s7417_s4 + $0x180] sm:$0xff] }
 0x290   :  { %718 = vmatpush.bf16.msra.mxu0 %v3959_v29  ;;  %731 = vmatpush.bf16.msra.mxu1 %v3963_v30  ;;  %v5620_v28 = vld [vmem:[%s7417_s4 + $0x1c0] sm:$0xff]  ;;  %v5597_v29 = vld [vmem:[%s7417_s4 + $0x108] sm:$0xff] }
 0x291   :  { %v5605_v30 = vld [vmem:[%s7417_s4 + $0x148] sm:$0xff] }
 0x299   :  { %4036 = vmatmul.msk.bf16.vlgmr.msra.gmra.mxu2 %vm246_vm5, %v6190_v51  ;;  %4037 = vmatmul.msk.bf16.vlgmr.msra.gmra.mxu3 %vm246_vm5, %v6190_v51 }
 0x29a   :  { %4038 = vmatmul.msk.bf16.vlgmr.msrb.gmra.mxu0 %vm246_vm5, %v6190_v51  ;;  %4039 = vmatmul.msk.bf16.vlgmr.msrb.gmra.mxu1 %vm246_vm5, %v6190_v51 }
 0x29b   :  { %1820 = vmatpush.bf16.msrb.mxu0 %v5587_v31  ;;  %1833 = vmatpush.bf16.msrb.mxu1 %v5595_v32  ;;  %v5596_v31 = vld [vmem:[%s7417_s4 + $0x100] sm:$0xff] }
 0x29c   :  { %1794 = vmatpush.bf16.msra.mxu2 %v5571_v22  ;;  %1807 = vmatpush.bf16.msra.mxu3 %v5579_v23  ;;  %v5604_v32 = vld [vmem:[%s7417_s4 + $0x140] sm:$0xff] }
 0x29d   :  { %v6491_v22 = vld [vmem:[%s7420_s7] sm:$0xff] }
 0x29e   :  { %v336_v23 = vperm.slane %v6491_v22, 2 }
 0x29f   :  { %1821 = vmatpush.bf16.msrb.mxu0 %v5586_v11  ;;  %1834 = vmatpush.bf16.msrb.mxu1 %v5594_v33  ;;  %v337_v11 = vperm.slane %v6491_v22, 3 }
 0x2a0   :  { %1795 = vmatpush.bf16.msra.mxu2 %v5570_v34  ;;  %1808 = vmatpush.bf16.msra.mxu3 %v5578_v35 }
 0x2a3   :  { %1822 = vmatpush.bf16.msrb.mxu0 %v5585_v36  ;;  %1835 = vmatpush.bf16.msrb.mxu1 %v5593_v38  ;;  %v334_v38 = vperm.slane %v6491_v22, 0 }
 0x2a4   :  { %1796 = vmatpush.bf16.msra.mxu2 %v5569_v40  ;;  %1809 = vmatpush.bf16.msra.mxu3 %v5577_v42  ;;  %v335_v40 = vperm.slane %v6491_v22, 1 }
 0x2a7   :  { %1823 = vmatpush.bf16.msrb.mxu0 %v5584_v43  ;;  %1836 = vmatpush.bf16.msrb.mxu1 %v5592_v44  ;;  %v5651_v44 = vld [vmem:[%s7417_s4 + $0x2b8] sm:$0xff] }
 0x2a8   :  { %1797 = vmatpush.bf16.msra.mxu2 %v5568_v45  ;;  %1810 = vmatpush.bf16.msra.mxu3 %v5576_v46  ;;  %v5659_v45 = vld [vmem:[%s7417_s4 + $0x2f8] sm:$0xff] }
 0x2a9   :  { %4040 = vmatmul.msk.bf16.vlgmr.msrb.gmra.mxu2 %vm246_vm5, %v6190_v51  ;;  %4041 = vmatmul.msk.bf16.vlgmr.msrb.gmra.mxu3 %vm246_vm5, %v6190_v51 }
 0x2aa   :  { %4042 = vmatmul.msk.bf16.vlgmr.msra.gmra.mxu0 %vm246_vm5, %v6190_v51  ;;  %4043 = vmatmul.msk.bf16.vlgmr.msra.gmra.mxu1 %vm246_vm5, %v6190_v51  ;;  %v5574_v51 = vld [vmem:[%s7417_s4 + $0x50] sm:$0xff] }
 0x2ab   :  { %1824 = vmatpush.bf16.msrb.mxu0 %v5583_v47  ;;  %1837 = vmatpush.bf16.msrb.mxu1 %v5591_v41 }
 0x2ac   :  { %1798 = vmatpush.bf16.msra.mxu2 %v5567_v48  ;;  %1811 = vmatpush.bf16.msra.mxu3 %v5575_v49 }
 0x2af   :  { %1825 = vmatpush.bf16.msrb.mxu0 %v5582_v50  ;;  %1838 = vmatpush.bf16.msrb.mxu1 %v5590_v52 }
 0x2b0   :  { %1799 = vmatpush.bf16.msra.mxu2 %v5566_v39  ;;  %1812 = vmatpush.bf16.msra.mxu3 %v5574_v51 }
 0x2b3   :  { %1826 = vmatpush.bf16.msrb.mxu0 %v5581_v53  ;;  %1839 = vmatpush.bf16.msrb.mxu1 %v5589_v54  ;;  %v5650_v54 = vld [vmem:[%s7417_s4 + $0x2b0] sm:$0xff] }
 0x2b4   :  { %1800 = vmatpush.bf16.msra.mxu2 %v5565_v55  ;;  %1813 = vmatpush.bf16.msra.mxu3 %v5573_v56  ;;  %v5658_v55 = vld [vmem:[%s7417_s4 + $0x2f0] sm:$0xff] }
 0x2b7   :  { %1827 = vmatpush.bf16.msrb.mxu0 %v5580_v57  ;;  %1840 = vmatpush.bf16.msrb.mxu1 %v5588_v58  ;;  %v5635_v58 = vld [vmem:[%s7417_s4 + $0x238] sm:$0xff] }
 0x2b8   :  { %1801 = vmatpush.bf16.msra.mxu2 %v5564_v61  ;;  %1814 = vmatpush.bf16.msra.mxu3 %v5572_v62  ;;  %v5657_v61 = vld [vmem:[%s7417_s4 + $0x2e8] sm:$0xff] }
 0x2bb   :  { %1872 = vmatpush.bf16.msra.mxu0 %v5619_v59  ;;  %1885 = vmatpush.bf16.msra.mxu1 %v5627_v60  ;;  %v5643_v59 = vld [vmem:[%s7417_s4 + $0x278] sm:$0xff]  ;;  %v5649_v60 = vld [vmem:[%s7417_s4 + $0x2a8] sm:$0xff] }
 0x2bc   :  { %1846 = vmatpush.bf16.msrb.mxu2 %v5603_v63  ;;  %1859 = vmatpush.bf16.msrb.mxu3 %v5611_v0  ;;  %v340_v0 = vperm.slane %v6491_v22, 6 }
 0x2bf   :  { %1873 = vmatpush.bf16.msra.mxu0 %v5618_v1  ;;  %1886 = vmatpush.bf16.msra.mxu1 %v5626_v2  ;;  %v341_v1 = vperm.slane %v6491_v22, 7  ;;  %v5634_v2 = vld [vmem:[%s7417_s4 + $0x230] sm:$0xff] }
 0x2c0   :  { %1847 = vmatpush.bf16.msrb.mxu2 %v5602_v3  ;;  %1860 = vmatpush.bf16.msrb.mxu3 %v5610_v4  ;;  %v5642_v3 = vld [vmem:[%s7417_s4 + $0x270] sm:$0xff] }
 0x2c3   :  { %1874 = vmatpush.bf16.msra.mxu0 %v5617_v5  ;;  %1887 = vmatpush.bf16.msra.mxu1 %v5625_v6  ;;  %v5648_v6 = vld [vmem:[%s7417_s4 + $0x2a0] sm:$0xff] }
 0x2c4   :  { %1848 = vmatpush.bf16.msrb.mxu2 %v5601_v7  ;;  %1861 = vmatpush.bf16.msrb.mxu3 %v5609_v8  ;;  %v5656_v7 = vld [vmem:[%s7417_s4 + $0x2e0] sm:$0xff] }
 0x2c7   :  { %1875 = vmatpush.bf16.msra.mxu0 %v5616_v9  ;;  %1888 = vmatpush.bf16.msra.mxu1 %v5624_v10  ;;  %v5633_v10 = vld [vmem:[%s7417_s4 + $0x228] sm:$0xff] }
 0x2c8   :  { %1849 = vmatpush.bf16.msrb.mxu2 %v5600_v12  ;;  %1862 = vmatpush.bf16.msrb.mxu3 %v5608_v13  ;;  %v5641_v12 = vld [vmem:[%s7417_s4 + $0x268] sm:$0xff]  ;;  %v338_v13 = vperm.slane %v6491_v22, 4 }
 0x2cb   :  { %1876 = vmatpush.bf16.msra.mxu0 %v5615_v15  ;;  %1889 = vmatpush.bf16.msra.mxu1 %v5623_v14  ;;  %v339_v15 = vperm.slane %v6491_v22, 5 }
 0x2cc   :  { %1850 = vmatpush.bf16.msrb.mxu2 %v5599_v18  ;;  %1863 = vmatpush.bf16.msrb.mxu3 %v5607_v19  ;;  %v5655_v18 = vld [vmem:[%s7417_s4 + $0x2d8] sm:$0xff] }
 0x2cf   :  { %1877 = vmatpush.bf16.msra.mxu0 %v5614_v16  ;;  %1890 = vmatpush.bf16.msra.mxu1 %v5622_v17  ;;  %v5647_v17 = vld [vmem:[%s7417_s4 + $0x298] sm:$0xff] }
 0x2d0   :  { %1851 = vmatpush.bf16.msrb.mxu2 %v5598_v25  ;;  %1864 = vmatpush.bf16.msrb.mxu3 %v5606_v26 }
 0x2d3   :  { %1878 = vmatpush.bf16.msra.mxu0 %v5613_v20  ;;  %1891 = vmatpush.bf16.msra.mxu1 %v5621_v24 }
 0x2d4   :  { %1852 = vmatpush.bf16.msrb.mxu2 %v5597_v29  ;;  %1865 = vmatpush.bf16.msrb.mxu3 %v5605_v30  ;;  %v5640_v29 = vld [vmem:[%s7417_s4 + $0x260] sm:$0xff] }
 0x2d7   :  { %1879 = vmatpush.bf16.msra.mxu0 %v5612_v27  ;;  %1892 = vmatpush.bf16.msra.mxu1 %v5620_v28  ;;  %v5632_v28 = vld [vmem:[%s7417_s4 + $0x220] sm:$0xff] }
 0x2d8   :  { %1853 = vmatpush.bf16.msrb.mxu2 %v5596_v31  ;;  %1866 = vmatpush.bf16.msrb.mxu3 %v5604_v32 }
 0x2f7   :  { %v564_v33 = vpop.f32.mrf.mxu0  ;;  %v577_v34 = vpop.f32.mrf.mxu1 }
 0x2f8   :  { %v565_v35 = vadd.f32 %v564_v33, %v336_v23  ;;  %v578_v36 = vadd.f32 %v577_v34, %v337_v11  ;;  %v5646_v23 = vld [vmem:[%s7417_s4 + $0x290] sm:$0xff] }
 0x2f9   :  { %v5654_v11 = vld [vmem:[%s7417_s4 + $0x2d0] sm:$0xff] }
 0x2fa   :  { %v739_v42 = vmax.f32 %v565_v35, 0.0  ;;  %v740_v43 = vmax.f32 %v578_v36, 0.0  ;;  %v5631_v35 = vld [vmem:[%s7417_s4 + $0x218] sm:$0xff] }
 0x2fb   :  { %v5639_v36 = vld [vmem:[%s7417_s4 + $0x258] sm:$0xff] }
 0x2fc   :  { %v755_v46 = vpack.c.bf16 %v739_v42, %v739_v42  ;;  %v756_v47 = vpack.c.bf16 %v740_v43, %v740_v43  ;;  %v538_v41 = vpop.f32.mrf.mxu2  ;;  %v551_v48 = vpop.f32.mrf.mxu3  ;;  %v5653_v42 = vld [vmem:[%s7417_s4 + $0x2c8] sm:$0xff] }
 0x2fd   :  { %v539_v49 = vadd.f32 %v538_v41, %v334_v38  ;;  %v552_v50 = vadd.f32 %v551_v48, %v335_v40  ;;  %v6570_v38 = vld [vmem:[%s7420_s7 + $0x8] sm:$0xff]  ;;  %v5638_v41 = vld [vmem:[%s7417_s4 + $0x250] sm:$0xff] }
 0x2fe   :  { %1828 = vmatmul.bf16.vlgmr.msrb.gmra.mxu0 %v755_v46  ;;  %1841 = vmatmul.bf16.vlgmr.msrb.gmra.mxu1 %v756_v47  ;;  %v5645_v40 = vld [vmem:[%s7417_s4 + $0x288] sm:$0xff]  ;;  %v345_v46 = vperm.slane %v6570_v38, 3  ;;  %v5630_v47 = vld [vmem:[%s7417_s4 + $0x210] sm:$0xff] }
 0x2ff   :  { %v737_v52 = vmax.f32 %v539_v49, 0.0  ;;  %v738_v39 = vmax.f32 %v552_v50, 0.0  ;;  %1924 = vmatpush.bf16.msrb.mxu0 %v5651_v44  ;;  %1937 = vmatpush.bf16.msrb.mxu1 %v5659_v45  ;;  %v566_v51 = vpop.f32.mrf.mxu0  ;;  %v579_v53 = vpop.f32.mrf.mxu1  ;;  %v344_v45 = vperm.slane %v6570_v38, 2  ;;  %v5644_v50 = vld [vmem:[%s7417_s4 + $0x280] sm:$0xff] }
 0x300   :  { %v5683_v53 = vld [vmem:[%s7417_s4 + $0x3b8] sm:$0xff] }
 0x301   :  { %v753_v56 = vpack.c.bf16 %v737_v52, %v737_v52  ;;  %v754_v57 = vpack.c.bf16 %v738_v39, %v738_v39  ;;  %v5652_v52 = vld [vmem:[%s7417_s4 + $0x2c0] sm:$0xff] }
 0x303   :  { %1925 = vmatpush.bf16.msrb.mxu0 %v5650_v54  ;;  %1938 = vmatpush.bf16.msrb.mxu1 %v5658_v55  ;;  %v5691_v54 = vld [vmem:[%s7417_s4 + $0x3f8] sm:$0xff]  ;;  %v5629_v55 = vld [vmem:[%s7417_s4 + $0x208] sm:$0xff] }
 0x304   :  { %1802 = vmatmul.bf16.vlgmr.msra.gmra.mxu2 %v753_v56  ;;  %1815 = vmatmul.bf16.vlgmr.msra.gmra.mxu3 %v754_v57  ;;  %v540_v62 = vpop.f32.mrf.mxu2  ;;  %v553_v63 = vpop.f32.mrf.mxu3  ;;  %v5637_v56 = vld [vmem:[%s7417_s4 + $0x248] sm:$0xff]  ;;  %v342_v57 = vperm.slane %v6570_v38, 0 }
 0x305   :  { %1898 = vmatpush.bf16.msra.mxu2 %v5635_v58  ;;  %1911 = vmatpush.bf16.msra.mxu3 %v5643_v59  ;;  %v343_v58 = vperm.slane %v6570_v38, 1 }
 0x307   :  { %1926 = vmatpush.bf16.msrb.mxu0 %v5649_v60  ;;  %1939 = vmatpush.bf16.msrb.mxu1 %v5657_v61  ;;  %v616_v4 = vpop.f32.mrf.mxu0  ;;  %v629_v5 = vpop.f32.mrf.mxu1 }
 0x308   :  { %v617_v8 = vadd.f32 %v616_v4, %v340_v0  ;;  %v630_v9 = vadd.f32 %v629_v5, %v341_v1  ;;  %v5682_v1 = vld [vmem:[%s7417_s4 + $0x3b0] sm:$0xff]  ;;  %v5628_v5 = vld [vmem:[%s7417_s4 + $0x200] sm:$0xff] }
 0x309   :  { %1899 = vmatpush.bf16.msra.mxu2 %v5634_v2  ;;  %1912 = vmatpush.bf16.msra.mxu3 %v5642_v3  ;;  %v5690_v2 = vld [vmem:[%s7417_s4 + $0x3f0] sm:$0xff] }
 0x30a   :  { %v743_v14 = vmax.f32 %v617_v8, 0.0  ;;  %v744_v16 = vmax.f32 %v630_v9, 0.0  ;;  %v5675_v8 = vld [vmem:[%s7417_s4 + $0x378] sm:$0xff] }
 0x30b   :  { %1927 = vmatpush.bf16.msrb.mxu0 %v5648_v6  ;;  %1940 = vmatpush.bf16.msrb.mxu1 %v5656_v7  ;;  %v5636_v6 = vld [vmem:[%s7417_s4 + $0x240] sm:$0xff]  ;;  %v5667_v7 = vld [vmem:[%s7417_s4 + $0x338] sm:$0xff] }
 0x30c   :  { %v759_v19 = vpack.c.bf16 %v743_v14, %v743_v14  ;;  %v760_v20 = vpack.c.bf16 %v744_v16, %v744_v16  ;;  %v590_v24 = vpop.f32.mrf.mxu2  ;;  %v603_v25 = vpop.f32.mrf.mxu3  ;;  %v5689_v14 = vld [vmem:[%s7417_s4 + $0x3e8] sm:$0xff] }
 0x30d   :  { %1900 = vmatpush.bf16.msra.mxu2 %v5633_v10  ;;  %1913 = vmatpush.bf16.msra.mxu3 %v5641_v12  ;;  %v591_v26 = vadd.f32 %v590_v24, %v338_v13  ;;  %v604_v27 = vadd.f32 %v603_v25, %v339_v15  ;;  %v5681_v15 = vld [vmem:[%s7417_s4 + $0x3a8] sm:$0xff]  ;;  %v5680_v25 = vld [vmem:[%s7417_s4 + $0x3a0] sm:$0xff] }
 0x30e   :  { %1880 = vmatmul.bf16.vlgmr.msra.gmra.mxu0 %v759_v19  ;;  %1893 = vmatmul.bf16.vlgmr.msra.gmra.mxu1 %v760_v20  ;;  %v5674_v19 = vld [vmem:[%s7417_s4 + $0x370] sm:$0xff] }
 0x30f   :  { %v741_v30 = vmax.f32 %v591_v26, 0.0  ;;  %v742_v31 = vmax.f32 %v604_v27, 0.0  ;;  %1928 = vmatpush.bf16.msrb.mxu0 %v5647_v17  ;;  %1941 = vmatpush.bf16.msrb.mxu1 %v5655_v18  ;;  %v618_v32 = vpop.f32.mrf.mxu0  ;;  %v631_v22 = vpop.f32.mrf.mxu1  ;;  %v5666_v18 = vld [vmem:[%s7417_s4 + $0x330] sm:$0xff]  ;;  %v5688_v26 = vld [vmem:[%s7417_s4 + $0x3e0] sm:$0xff]  ;;  %v5665_v27 = vld [vmem:[%s7417_s4 + $0x328] sm:$0xff] }
 0x310   :  { %v5687_v32 = vld [vmem:[%s7417_s4 + $0x3d8] sm:$0xff]  ;;  %v5664_v22 = vld [vmem:[%s7417_s4 + $0x320] sm:$0xff] }
 0x311   :  { %v757_v33 = vpack.c.bf16 %v741_v30, %v741_v30  ;;  %v758_v34 = vpack.c.bf16 %v742_v31, %v742_v31  ;;  %1901 = vmatpush.bf16.msra.mxu2 %v5632_v28  ;;  %1914 = vmatpush.bf16.msra.mxu3 %v5640_v29  ;;  %v5673_v28 = vld [vmem:[%s7417_s4 + $0x368] sm:$0xff]  ;;  %v5679_v31 = vld [vmem:[%s7417_s4 + $0x398] sm:$0xff] }
 0x313   :  { %1929 = vmatpush.bf16.msrb.mxu0 %v5646_v23  ;;  %1942 = vmatpush.bf16.msrb.mxu1 %v5654_v11  ;;  %v5672_v23 = vld [vmem:[%s7417_s4 + $0x360] sm:$0xff] }
 0x314   :  { %1854 = vmatmul.bf16.vlgmr.msrb.gmra.mxu2 %v757_v33  ;;  %1867 = vmatmul.bf16.vlgmr.msrb.gmra.mxu3 %v758_v34  ;;  %v592_v43 = vpop.f32.mrf.mxu2  ;;  %v605_v44 = vpop.f32.mrf.mxu3  ;;  %v5678_v34 = vld [vmem:[%s7417_s4 + $0x390] sm:$0xff] }
 0x315   :  { %1902 = vmatpush.bf16.msra.mxu2 %v5631_v35  ;;  %1915 = vmatpush.bf16.msra.mxu3 %v5639_v36  ;;  %v5686_v35 = vld [vmem:[%s7417_s4 + $0x3d0] sm:$0xff]  ;;  %v348_v36 = vperm.slane %v6570_v38, 6  ;;  %v5671_v43 = vld [vmem:[%s7417_s4 + $0x358] sm:$0xff] }
 0x317   :  { %1930 = vmatpush.bf16.msrb.mxu0 %v5645_v40  ;;  %1943 = vmatpush.bf16.msrb.mxu1 %v5653_v42  ;;  %v668_v48 = vpop.f32.mrf.mxu0  ;;  %v681_v49 = vpop.f32.mrf.mxu1  ;;  %v349_v40 = vperm.slane %v6570_v38, 7  ;;  %v5663_v42 = vld [vmem:[%s7417_s4 + $0x318] sm:$0xff] }
 0x318   :  { %v669_v39 = vadd.f32 %v668_v48, %v344_v45  ;;  %v682_v51 = vadd.f32 %v681_v49, %v345_v46  ;;  %v5677_v46 = vld [vmem:[%s7417_s4 + $0x388] sm:$0xff]  ;;  %v5662_v49 = vld [vmem:[%s7417_s4 + $0x310] sm:$0xff] }
 0x319   :  { %1903 = vmatpush.bf16.msra.mxu2 %v5630_v47  ;;  %1916 = vmatpush.bf16.msra.mxu3 %v5638_v41  ;;  %v5685_v47 = vld [vmem:[%s7417_s4 + $0x3c8] sm:$0xff] }
 0x31a   :  { %v747_v59 = vmax.f32 %v669_v39, 0.0  ;;  %v748_v60 = vmax.f32 %v682_v51, 0.0  ;;  %v347_v39 = vperm.slane %v6570_v38, 5 }
 0x31b   :  { %1931 = vmatpush.bf16.msrb.mxu0 %v5644_v50  ;;  %1944 = vmatpush.bf16.msrb.mxu1 %v5652_v52  ;;  %v5670_v50 = vld [vmem:[%s7417_s4 + $0x350] sm:$0xff]  ;;  %v346_v52 = vperm.slane %v6570_v38, 4  ;;  %v5661_v38 = vld [vmem:[%s7417_s4 + $0x308] sm:$0xff] }
 0x31c   :  { %v763_v61 = vpack.c.bf16 %v747_v59, %v747_v59  ;;  %v764_v62 = vpack.c.bf16 %v748_v60, %v748_v60  ;;  %v642_v63 = vpop.f32.mrf.mxu2  ;;  %v655_v0 = vpop.f32.mrf.mxu3 }
 0x31d   :  { %1904 = vmatpush.bf16.msra.mxu2 %v5629_v55  ;;  %1917 = vmatpush.bf16.msra.mxu3 %v5637_v56  ;;  %v643_v3 = vadd.f32 %v642_v63, %v342_v57  ;;  %v656_v4 = vadd.f32 %v655_v0, %v343_v58  ;;  %v5684_v55 = vld [vmem:[%s7417_s4 + $0x3c0] sm:$0xff]  ;;  %v5669_v58 = vld [vmem:[%s7417_s4 + $0x348] sm:$0xff] }
 0x31e   :  { %1932 = vmatmul.bf16.vlgmr.msrb.gmra.mxu0 %v763_v61  ;;  %1945 = vmatmul.bf16.vlgmr.msrb.gmra.mxu1 %v764_v62  ;;  %v5660_v63 = vld [vmem:[%s7417_s4 + $0x300] sm:$0xff] }
 0x31f   :  { %1976 = vmatpush.bf16.msra.mxu0 %v5683_v53  ;;  %1989 = vmatpush.bf16.msra.mxu1 %v5691_v54  ;;  %v745_v9 = vmax.f32 %v643_v3, 0.0  ;;  %v746_v10 = vmax.f32 %v656_v4, 0.0  ;;  %v670_v12 = vpop.f32.mrf.mxu0  ;;  %v683_v13 = vpop.f32.mrf.mxu1  ;;  %v5676_v54 = vld [vmem:[%s7417_s4 + $0x380] sm:$0xff] }
 0x320   :  { %v5668_v0 = vld [vmem:[%s7417_s4 + $0x340] sm:$0xff] }
 0x321   :  { %v761_v16 = vpack.c.bf16 %v745_v9, %v745_v9  ;;  %v762_v17 = vpack.c.bf16 %v746_v10, %v746_v10  ;;  %1905 = vmatpush.bf16.msra.mxu2 %v5628_v5  ;;  %1918 = vmatpush.bf16.msra.mxu3 %v5636_v6 }
 0x323   :  { %1977 = vmatpush.bf16.msra.mxu0 %v5682_v1  ;;  %1990 = vmatpush.bf16.msra.mxu1 %v5690_v2 }
 0x324   :  { %v644_v20 = vpop.f32.mrf.mxu2  ;;  %v657_v24 = vpop.f32.mrf.mxu3  ;;  %1906 = vmatmul.bf16.vlgmr.msra.gmra.mxu2 %v761_v16  ;;  %1919 = vmatmul.bf16.vlgmr.msra.gmra.mxu3 %v762_v17 }
 0x325   :  { %1950 = vmatpush.bf16.msrb.mxu2 %v5667_v7  ;;  %1963 = vmatpush.bf16.msrb.mxu3 %v5675_v8 }
 0x327   :  { %1978 = vmatpush.bf16.msra.mxu0 %v5681_v15  ;;  %1991 = vmatpush.bf16.msra.mxu1 %v5689_v14  ;;  %v720_v29 = vpop.f32.mrf.mxu0  ;;  %v733_v30 = vpop.f32.mrf.mxu1 }
 0x328   :  { %v721_v41 = vadd.f32 %v720_v29, %v348_v36  ;;  %v734_v48 = vadd.f32 %v733_v30, %v349_v40 }
 0x329   :  { %1951 = vmatpush.bf16.msrb.mxu2 %v5666_v18  ;;  %1964 = vmatpush.bf16.msrb.mxu3 %v5674_v19  ;;  %v5869_v18 = vld [vmem:[%s7419_s6 + $0x3] ss:$0 sm:$0xff] }
 0x32a   :  { %v751_v56 = vmax.f32 %v721_v41, 0.0  ;;  %v752_v57 = vmax.f32 %v734_v48, 0.0 }
 0x32b   :  { %1979 = vmatpush.bf16.msra.mxu0 %v5680_v25  ;;  %1992 = vmatpush.bf16.msra.mxu1 %v5688_v26 }
 0x32c   :  { %v694_v11 = vpop.f32.mrf.mxu2  ;;  %v707_v33 = vpop.f32.mrf.mxu3  ;;  %v767_v61 = vpack.c.bf16 %v751_v56, %v751_v56  ;;  %v768_v62 = vpack.c.bf16 %v752_v57, %v752_v57 }
 0x32d   :  { %1952 = vmatpush.bf16.msrb.mxu2 %v5665_v27  ;;  %1965 = vmatpush.bf16.msrb.mxu3 %v5673_v28  ;;  %v695_v59 = vadd.f32 %v694_v11, %v346_v52  ;;  %v708_v60 = vadd.f32 %v707_v33, %v347_v39 }
 0x32f   :  { %1980 = vmatpush.bf16.msra.mxu0 %v5679_v31  ;;  %1993 = vmatpush.bf16.msra.mxu1 %v5687_v32  ;;  %v722_v44 = vpop.f32.mrf.mxu0  ;;  %v735_v45 = vpop.f32.mrf.mxu1  ;;  %v749_v1 = vmax.f32 %v695_v59, 0.0  ;;  %v750_v2 = vmax.f32 %v708_v60, 0.0 }
 0x331   :  { %1953 = vmatpush.bf16.msrb.mxu2 %v5664_v22  ;;  %1966 = vmatpush.bf16.msrb.mxu3 %v5672_v23  ;;  %v765_v3 = vpack.c.bf16 %v749_v1, %v749_v1  ;;  %v766_v4 = vpack.c.bf16 %v750_v2, %v750_v2 }
 0x333   :  { %1981 = vmatpush.bf16.msra.mxu0 %v5678_v34  ;;  %1994 = vmatpush.bf16.msra.mxu1 %v5686_v35 }
 0x334   :  { %v696_v51 = vpop.f32.mrf.mxu2  ;;  %v709_v53 = vpop.f32.mrf.mxu3 }
 0x335   :  { %1954 = vmatpush.bf16.msrb.mxu2 %v5663_v42  ;;  %1967 = vmatpush.bf16.msrb.mxu3 %v5671_v43 }
 0x337   :  { %1982 = vmatpush.bf16.msra.mxu0 %v5677_v46  ;;  %1995 = vmatpush.bf16.msra.mxu1 %v5685_v47 }
 0x339   :  { %1955 = vmatpush.bf16.msrb.mxu2 %v5662_v49  ;;  %1968 = vmatpush.bf16.msrb.mxu3 %v5670_v50 }
 0x33b   :  { %1983 = vmatpush.bf16.msra.mxu0 %v5676_v54  ;;  %1996 = vmatpush.bf16.msra.mxu1 %v5684_v55 }
 0x33d   :  { %1956 = vmatpush.bf16.msrb.mxu2 %v5661_v38  ;;  %1969 = vmatpush.bf16.msrb.mxu3 %v5669_v58 }
 0x33e   :  { %1984 = vmatmul.bf16.vlgmr.msra.gmra.mxu0 %v767_v61  ;;  %1997 = vmatmul.bf16.vlgmr.msra.gmra.mxu1 %v768_v62 }
 0x341   :  { %1957 = vmatpush.bf16.msrb.mxu2 %v5660_v63  ;;  %1970 = vmatpush.bf16.msrb.mxu3 %v5668_v0  ;;  %v5693_v63 = vld [vmem:[%s7415_s2 + $0x18] sm:$0xff] }
 0x344   :  { %1958 = vmatmul.bf16.vlgmr.msrb.gmra.mxu2 %v765_v3  ;;  %1971 = vmatmul.bf16.vlgmr.msrb.gmra.mxu3 %v766_v4 }
 0x345   :  { %2064 = vmatpush.bf16.msra.mxu2 %v5693_v63 }
 0x37b   :  { %v1829_v5 = vpop.f32.mrf.mxu0  ;;  %v1842_v6 = vpop.f32.mrf.mxu1 }
 0x383   :  { %v1831_v7 = vpop.f32.mrf.mxu0  ;;  %v1844_v8 = vpop.f32.mrf.mxu1 }
 0x387   :  { %v1803_v9 = vpop.f32.mrf.mxu2  ;;  %v1816_v10 = vpop.f32.mrf.mxu3 }
 0x388   :  { %v1804_v24 = vadd.f32 %v5869_v18, %v1803_v9  ;;  %v5870_v9 = vld [vmem:[%s7419_s6 + $0x4] ss:$0 sm:$0xff] }
 0x38a   :  { %v1817_v27 = vadd.f32 %v1816_v10, %v1804_v24 }
 0x38b   :  { %v1881_v12 = vpop.f32.mrf.mxu0  ;;  %v1894_v13 = vpop.f32.mrf.mxu1 }
 0x38c   :  { %v1830_v30 = vadd.f32 %v1829_v5, %v1817_v27 }
 0x38e   :  { %v1843_v22 = vadd.f32 %v1842_v6, %v1830_v30 }
 0x38f   :  { %v1805_v15 = vpop.f32.mrf.mxu2  ;;  %v1818_v14 = vpop.f32.mrf.mxu3 }
 0x393   :  { %v1883_v16 = vpop.f32.mrf.mxu0  ;;  %v1896_v17 = vpop.f32.mrf.mxu1 }
 0x394   :  { %v5872_v17 = vld [vmem:[%s7419_s6 + $0x8] ss:$0 sm:$0xff] }
 0x397   :  { %v1855_v19 = vpop.f32.mrf.mxu2  ;;  %v1868_v20 = vpop.f32.mrf.mxu3 }
 0x398   :  { %v1856_v33 = vadd.f32 %v1855_v19, %v1843_v22  ;;  %v5710_v22 = vld [vmem:[%s7416_s3 + $0x184] sm:$0xf] }
 0x39a   :  { %v1869_v34 = vadd.f32 %v1868_v20, %v1856_v33  ;;  %v4683_v33 = vld [vmem:[%s7416_s3 + $0x188] sm:$0xf] }
 0x39b   :  { %v1933_v25 = vpop.f32.mrf.mxu0  ;;  %v1946_v26 = vpop.f32.mrf.mxu1 }
 0x39c   :  { %v1882_v40 = vadd.f32 %v1881_v12, %v1869_v34  ;;  %v5871_v12 = vld [vmem:[%s7419_s6 + $0x5] ss:$0 sm:$0xff]  ;;  %v5719_v34 = vld [vmem:[%s7416_s3 + $0x1c4] sm:$0xf0] }
 0x39e   :  { %v1895_v42 = vadd.f32 %v1894_v13, %v1882_v40  ;;  %v5711_v40 = vld [vmem:[%s7416_s3 + $0x18c] sm:$0xf] }
 0x39f   :  { %v1857_v28 = vpop.f32.mrf.mxu2  ;;  %v1870_v29 = vpop.f32.mrf.mxu3 }
 0x3a3   :  { %v1935_v31 = vpop.f32.mrf.mxu0  ;;  %v1948_v32 = vpop.f32.mrf.mxu1 }
 0x3a4   :  { %v4675_v31 = vld [vmem:[%s7416_s3 + $0x180] sm:$0xf] }
 0x3a5   :  { %v5718_v32 = vld [vmem:[%s7416_s3 + $0x1bc] sm:$0xf0] }
 0x3a7   :  { %v1907_v23 = vpop.f32.mrf.mxu2  ;;  %v1920_v11 = vpop.f32.mrf.mxu3 }
 0x3a8   :  { %v1908_v43 = vadd.f32 %v1907_v23, %v1895_v42  ;;  %v4676_v23 = vor.u32 %v5718_v32, %v4675_v31  ;;  %v4685_v42 = vld [vmem:[%s7416_s3 + $0x1c8] sm:$0xf0]  ;;  %v4707_v31 = vld [vmem:[%s7416_s3 + $0x1a0] sm:$0xf] }
 0x3a9   :  { %v5722_v32 = vld [vmem:[%s7416_s3 + $0x1dc] sm:$0xf0] }
 0x3aa   :  { %v1921_v46 = vadd.f32 %v1920_v11, %v1908_v43  ;;  %v4677_v11 = vld [vmem:[%s7416_s3 + $0x1c0] sm:$0xf0]  ;;  %2338 = vmatpush.bf16.msra.mxu3 %v4676_v23  ;;  %v4688_v43 = vor.u32 %v5711_v40, %v4685_v42  ;;  %v4708_v40 = vor.u32 %v5722_v32, %v4707_v31 }
 0x3ab   :  { %v4709_v23 = vld [vmem:[%s7416_s3 + $0x1e0] sm:$0xf0] }
 0x3ac   :  { %v1934_v47 = vadd.f32 %v1933_v25, %v1921_v46  ;;  %v5694_v46 = vld [vmem:[%s7416_s3 + $0x104] sm:$0xf] }
 0x3ad   :  { %v5746_v31 = vld [vmem:[%s7417_s4 + $0x4a0] sm:$0xff] }
 0x3ae   :  { %v1947_v49 = vadd.f32 %v1946_v26, %v1934_v47  ;;  %v5730_v32 = vld [vmem:[%s7417_s4 + $0x420] sm:$0xff] }
 0x3af   :  { %v1909_v35 = vpop.f32.mrf.mxu2  ;;  %v1922_v36 = vpop.f32.mrf.mxu3 }
 0x3b0   :  { %v4680_v35 = vor.u32 %v5710_v22, %v4677_v11  ;;  %v4684_v36 = vor.u32 %v5719_v34, %v4683_v33  ;;  %v5714_v22 = vld [vmem:[%s7416_s3 + $0x1a4] sm:$0xf]  ;;  %v5723_v33 = vld [vmem:[%s7416_s3 + $0x1e4] sm:$0xf0]  ;;  %v5715_v34 = vld [vmem:[%s7416_s3 + $0x1ac] sm:$0xf] }
 0x3b1   :  { %v4712_v42 = vor.u32 %v5714_v22, %v4709_v23  ;;  %v5754_v22 = vld [vmem:[%s7417_s4 + $0x4e0] sm:$0xff]  ;;  %v5737_v23 = vld [vmem:[%s7417_s4 + $0x458] sm:$0xff] }
 0x3b2   :  { %2351 = vmatpush.bf16.msrb.mxu0 %v4680_v35  ;;  %2364 = vmatpush.bf16.msrb.mxu1 %v4684_v36  ;;  %v4717_v35 = vld [vmem:[%s7416_s3 + $0x1e8] sm:$0xf0] }
 0x3bb   :  { %v1985_v44 = vpop.f32.mrf.mxu0  ;;  %v1998_v45 = vpop.f32.mrf.mxu1 }
 0x3c3   :  { %v1987_v41 = vpop.f32.mrf.mxu0  ;;  %v2000_v48 = vpop.f32.mrf.mxu1 }
 0x3c4   :  { %v4613_v41 = vld [vmem:[%s7416_s3 + $0x140] sm:$0xf0]  ;;  %v4619_v48 = vld [vmem:[%s7416_s3 + $0x108] sm:$0xf] }
 0x3c7   :  { %v1959_v50 = vpop.f32.mrf.mxu2  ;;  %v1972_v52 = vpop.f32.mrf.mxu3 }
 0x3c8   :  { %v1960_v39 = vadd.f32 %v1959_v50, %v1947_v49  ;;  %v5703_v49 = vld [vmem:[%s7416_s3 + $0x144] sm:$0xf0]  ;;  %v4616_v50 = vor.u32 %v5694_v46, %v4613_v41  ;;  %v4720_v46 = vor.u32 %v5715_v34, %v4717_v35  ;;  %v4645_v41 = vld [vmem:[%s7416_s3 + $0x160] sm:$0xf0]  ;;  %v5753_v34 = vld [vmem:[%s7417_s4 + $0x4d8] sm:$0xff] }
 0x3c9   :  { %v5736_v35 = vld [vmem:[%s7417_s4 + $0x450] sm:$0xff] }
 0x3ca   :  { %v1973_v51 = vadd.f32 %v1972_v52, %v1960_v39  ;;  %v4620_v52 = vor.u32 %v5703_v49, %v4619_v48  ;;  %v5695_v39 = vld [vmem:[%s7416_s3 + $0x10c] sm:$0xf]  ;;  %2352 = vmatpush.bf16.msrb.mxu0 %v4616_v50  ;;  %v4651_v48 = vld [vmem:[%s7416_s3 + $0x128] sm:$0xf] }
 0x3cb   :  { %v5707_v49 = vld [vmem:[%s7416_s3 + $0x164] sm:$0xf0]  ;;  %v5699_v50 = vld [vmem:[%s7416_s3 + $0x12c] sm:$0xf] }
 0x3cc   :  { %v1986_v53 = vadd.f32 %v1985_v44, %v1973_v51  ;;  %v4611_v44 = vld [vmem:[%s7416_s3 + $0x100] sm:$0xf]  ;;  %v4621_v51 = vld [vmem:[%s7416_s3 + $0x148] sm:$0xf0]  ;;  %2365 = vmatpush.bf16.msrb.mxu1 %v4620_v52 }
 0x3cd   :  { %v4653_v52 = vld [vmem:[%s7416_s3 + $0x168] sm:$0xf0] }
 0x3ce   :  { %v1999_v54 = vadd.f32 %v1998_v45, %v1986_v53  ;;  %v5702_v45 = vld [vmem:[%s7416_s3 + $0x13c] sm:$0xf0]  ;;  %v4624_v53 = vor.u32 %v5695_v39, %v4621_v51 }
 0x3cf   :  { %v1961_v55 = vpop.f32.mrf.mxu2  ;;  %v1974_v56 = vpop.f32.mrf.mxu3  ;;  %v4612_v47 = vor.u32 %v5702_v45, %v4611_v44  ;;  %v5706_v44 = vld [vmem:[%s7416_s3 + $0x15c] sm:$0xf0] }
 0x3d0   :  { %v2002_v57 = vadd.f32 %v1999_v54, %v6177_v21  ;;  %v5692_v21 = vld [vmem:[%s7415_s2 + $0x10] sm:$0xff] }
 0x3d1   :  { %2065 = vmatpush.bf16.msra.mxu2 %v5692_v21  ;;  %2339 = vmatpush.bf16.msra.mxu3 %v4612_v47  ;;  %v4691_v55 = vld [vmem:[%s7416_s3 + $0x190] sm:$0xf]  ;;  %v5713_v21 = vld [vmem:[%s7416_s3 + $0x19c] sm:$0xf]  ;;  %v5698_v47 = vld [vmem:[%s7416_s3 + $0x124] sm:$0xf] }
 0x3d2   :  { %v2003_v38 = vsel %vm246_vm5, %v2002_v57, 0.0  ;;  %v5720_v56 = vld [vmem:[%s7416_s3 + $0x1cc] sm:$0xf0]  ;;  %v4648_v51 = vor.u32 %v5698_v47, %v4645_v41  ;;  %v5734_v47 = vld [vmem:[%s7417_s4 + $0x440] sm:$0xff] }
 0x3d3   :  { %2004 = vadd.xlane.f32.xlu1 %v2003_v38  ;;  %v5742_v41 = vld [vmem:[%s7417_s4 + $0x480] sm:$0xff] }
 0x3d5   :  { %2377 = vmatpush.bf16.msrb.mxu2 %v4688_v43  ;;  %v4643_v43 = vld [vmem:[%s7416_s3 + $0x120] sm:$0xf] }
 0x3d6   :  { %v4644_v39 = vor.u32 %v5706_v44, %v4643_v43  ;;  %v5735_v43 = vld [vmem:[%s7417_s4 + $0x448] sm:$0xff] }
 0x3d7   :  { %v5743_v44 = vld [vmem:[%s7417_s4 + $0x488] sm:$0xff] }
 0x3d9   :  { %2378 = vmatpush.bf16.msrb.mxu2 %v4624_v53  ;;  %v4652_v53 = vor.u32 %v5707_v49, %v4651_v48  ;;  %v5773_v48 = vld [vmem:[%s7417_s4 + $0x578] sm:$0xff] }
 0x3da   :  { %v5781_v49 = vld [vmem:[%s7417_s4 + $0x5b8] sm:$0xff] }
 0x446   :  { %v2005_v58 = vpop.xlane.xlu1 %2004 }
 0x447   :  { %v2006_v59 = vmul.f32 %v2005_v58, %v6050_v37  ;;  %v4692_v58 = vor.u32 %v5720_v56, %v4691_v55  ;;  %v4723_v55 = vld [vmem:[%s7416_s3 + $0x1b0] sm:$0xf] }
 0x448   :  { %v5724_v56 = vld [vmem:[%s7416_s3 + $0x1ec] sm:$0xf0] }
 0x449   :  { %v2007_v60 = vsub.f32 %v2002_v57, %v2006_v59  ;;  %v5712_v57 = vld [vmem:[%s7416_s3 + $0x194] sm:$0xf]  ;;  %2390 = vmatpush.bf16.msrb.mxu3 %v4692_v58  ;;  %v4731_v58 = vld [vmem:[%s7416_s3 + $0x1b8] sm:$0xf] }
 0x44a   :  { %v4693_v59 = vld [vmem:[%s7416_s3 + $0x1d0] sm:$0xf0] }
 0x44b   :  { %v2008_v61 = vmul.f32 %v2007_v60, %v2007_v60 }
 0x44d   :  { %v2009_v62 = vsel %vm246_vm5, %v2008_v61, 0.0  ;;  %v5721_v61 = vld [vmem:[%s7416_s3 + $0x1d4] sm:$0xf0] }
 0x44e   :  { %2010 = vadd.xlane.f32.xlu1 %v2009_v62  ;;  %v4696_v62 = vor.u32 %v5712_v57, %v4693_v59  ;;  %v5716_v57 = vld [vmem:[%s7416_s3 + $0x1b4] sm:$0xf]  ;;  %v5725_v59 = vld [vmem:[%s7416_s3 + $0x1f4] sm:$0xf0] }
 0x450   :  { %2403 = vmatpush.bf16.msra.mxu0 %v4696_v62  ;;  %v4724_v62 = vor.u32 %v5724_v56, %v4723_v55  ;;  %v5764_v55 = vld [vmem:[%s7417_s4 + $0x530] sm:$0xff] }
 0x451   :  { %v5788_v56 = vld [vmem:[%s7417_s4 + $0x5f0] sm:$0xff] }
 0x4c1   :  { %v2011_v0 = vpop.xlane.xlu1 %2010 }
 0x4c2   :  { %v2012_v1 = vmul.f32 %v2011_v0, %v6050_v37  ;;  %v4701_v0 = vld [vmem:[%s7416_s3 + $0x1d8] sm:$0xf0] }
 0x4c4   :  { %v2013_v2 = vadd.f32 1e-05, %v2012_v1  ;;  %v4627_v1 = vld [vmem:[%s7416_s3 + $0x110] sm:$0xf] }
 0x4c6   :  { %5883 = vrsqrt.f32 %v2013_v2  ;;  %vm2020_vm11 = vweird.f32 %v2013_v2 }
 0x4cc   :  { %v5884_v3 = vpop.eup %5883 }
 0x4cd   :  { %v2015_v4 = vmul.f32 %v5884_v3, %v2013_v2  ;;  %vm2021_vm10 = vweird.f32 %v5884_v3 }
 0x4ce   :  { %vm2022_vm12 = vmor %vm2020_vm11, %vm2021_vm10 }
 0x4cf   :  { %v2016_v5 = vmul.f32 %v5884_v3, %v2015_v4  ;;  %v5704_v4 = vld [vmem:[%s7416_s3 + $0x14c] sm:$0xf0] }
 0x4d1   :  { %v2017_v6 = vmul.f32 0.5, %v2016_v5  ;;  %v5696_v5 = vld [vmem:[%s7416_s3 + $0x114] sm:$0xf] }
 0x4d3   :  { %v2018_v7 = vsub.f32 1.5, %v2017_v6  ;;  %v4628_v6 = vor.u32 %v5704_v4, %v4627_v1  ;;  %v4732_v1 = vor.u32 %v5725_v59, %v4731_v58  ;;  %v4661_v4 = vld [vmem:[%s7416_s3 + $0x170] sm:$0xf0]  ;;  %v5763_v58 = vld [vmem:[%s7417_s4 + $0x528] sm:$0xff] }
 0x4d4   :  { %v5787_v59 = vld [vmem:[%s7417_s4 + $0x5e8] sm:$0xff] }
 0x4d5   :  { %v2019_v8 = vmul.f32 %v5884_v3, %v2018_v7  ;;  %v4629_v7 = vld [vmem:[%s7416_s3 + $0x150] sm:$0xf0]  ;;  %2391 = vmatpush.bf16.msrb.mxu3 %v4628_v6  ;;  %v5709_v6 = vld [vmem:[%s7416_s3 + $0x174] sm:$0xf0] }
 0x4d7   :  { %v2023_v10 = vsel %vm2022_vm12, %v5884_v3, %v2019_v8  ;;  %v4704_v3 = vor.u32 %v5713_v21, %v4701_v0  ;;  %v4635_v8 = vld [vmem:[%s7416_s3 + $0x118] sm:$0xf]  ;;  %v4659_v21 = vld [vmem:[%s7416_s3 + $0x130] sm:$0xf] }
 0x4d8   :  { %v2024_v13 = vmul.f32 %v2023_v10, %v2007_v60  ;;  %v4699_v60 = vld [vmem:[%s7416_s3 + $0x198] sm:$0xf]  ;;  %v4632_v10 = vor.u32 %v5696_v5, %v4629_v7  ;;  %v5708_v0 = vld [vmem:[%s7416_s3 + $0x16c] sm:$0xf0]  ;;  %v5701_v7 = vld [vmem:[%s7416_s3 + $0x13c] sm:$0xf] }
 0x4d9   :  { %v4700_v63 = vor.u32 %v5721_v61, %v4699_v60  ;;  %v5717_v60 = vld [vmem:[%s7416_s3 + $0x1bc] sm:$0xf]  ;;  %v4667_v5 = vld [vmem:[%s7416_s3 + $0x138] sm:$0xf] }
 0x4da   :  { %v2026_v15 = vmul.f32 %v5870_v9, %v2024_v13  ;;  %v5705_v9 = vld [vmem:[%s7416_s3 + $0x154] sm:$0xf0]  ;;  %v5697_v13 = vld [vmem:[%s7416_s3 + $0x11c] sm:$0xf]  ;;  %2404 = vmatpush.bf16.msra.mxu0 %v4632_v10 }
 0x4db   :  { %2416 = vmatpush.bf16.msra.mxu1 %v4700_v63  ;;  %v4733_v61 = vld [vmem:[%s7416_s3 + $0x1f8] sm:$0xf0] }
 0x4dc   :  { %v2028_v14 = vadd.f32 %v5871_v12, %v2026_v15  ;;  %v4636_v12 = vor.u32 %v5705_v9, %v4635_v8  ;;  %v4637_v15 = vld [vmem:[%s7416_s3 + $0x158] sm:$0xf0]  ;;  %v4660_v9 = vor.u32 %v5708_v0, %v4659_v21 }
 0x4dd   :  { %v4669_v8 = vld [vmem:[%s7416_s3 + $0x178] sm:$0xf0] }
 0x4de   :  { %v2036_v16 = vpack.c.bf16 %v2028_v14, %v2028_v14  ;;  %v5769_v21 = vld [vmem:[%s7417_s4 + $0x558] sm:$0xff] }
 0x4df   :  { %2417 = vmatpush.bf16.msra.mxu1 %v4636_v12  ;;  %v4668_v12 = vor.u32 %v5709_v6, %v4667_v5  ;;  %v5777_v0 = vld [vmem:[%s7417_s4 + $0x598] sm:$0xff]  ;;  %v5767_v5 = vld [vmem:[%s7417_s4 + $0x548] sm:$0xff] }
 0x4e0   :  { %4574 = vmatmul.msk.bf16.vlgmr.msra.gmra.mxu2 %vm246_vm5, %v2036_v16  ;;  %v5775_v6 = vld [vmem:[%s7417_s4 + $0x588] sm:$0xff] }
 0x4e1   :  { %2429 = vmatpush.bf16.msra.mxu2 %v4704_v3  ;;  %v5700_v3 = vld [vmem:[%s7416_s3 + $0x134] sm:$0xf] }
 0x4e2   :  { %v4664_v10 = vor.u32 %v5700_v3, %v4661_v4  ;;  %v5761_v3 = vld [vmem:[%s7417_s4 + $0x518] sm:$0xff] }
 0x4e3   :  { %v5785_v4 = vld [vmem:[%s7417_s4 + $0x5d8] sm:$0xff] }
 0x563   :  { %v2067_v18 = vpop.f32.mrf.mxu2 }
 0x564   :  { %v2068_v19 = vadd.f32 %v5872_v17, %v2067_v18 }
 0x566   :  { %v2071_v20 = vadd.f32 %v2068_v19, %v2028_v14  ;;  %v4640_v14 = vor.u32 %v5697_v13, %v4637_v15  ;;  %v4672_v13 = vor.u32 %v5701_v7, %v4669_v8  ;;  %v5741_v15 = vld [vmem:[%s7417_s4 + $0x478] sm:$0xff]  ;;  %v5760_v7 = vld [vmem:[%s7417_s4 + $0x510] sm:$0xff] }
 0x567   :  { %v5784_v8 = vld [vmem:[%s7417_s4 + $0x5d0] sm:$0xff] }
 0x568   :  { %v2072_v24 = vsel %vm246_vm5, %v2071_v20, 0.0  ;;  %2430 = vmatpush.bf16.msra.mxu2 %v4640_v14  ;;  %v5749_v14 = vld [vmem:[%s7417_s4 + $0x4b8] sm:$0xff] }
 0x569   :  { %2073 = vadd.xlane.f32.xlu2 %v2072_v24 }
 0x56b   :  { %v2069_v25 = vpop.f32.mrf.mxu2 }
 0x56c   :  { %v5873_v25 = vld [vmem:[%s7419_s6 + $0x9] ss:$0 sm:$0xff] }
 0x5dc   :  { %v2074_v26 = vpop.xlane.xlu2 %2073 }
 0x5dd   :  { %v2075_v27 = vmul.f32 %v2074_v26, %v6050_v37 }
 0x5df   :  { %v6732_v28 = vsub.f32 %v2071_v20, %v2075_v27  ;;  %v5874_v27 = vld [vmem:[%s7419_s6 + $0xa] ss:$0 sm:$0xff] }
 0x5e1   :  { %v2077_v29 = vmul.f32 %v6732_v28, %v6732_v28 }
 0x5e3   :  { %v2078_v30 = vsel %vm246_vm5, %v2077_v29, 0.0 }
 0x5e4   :  { %2079 = vadd.xlane.f32.xlu2 %v2078_v30 }
 0x657   :  { %v2080_v54 = vpop.xlane.xlu2 %2079 }
 0x658   :  { %v2081_v38 = vmul.f32 %v2080_v54, %v6050_v37  ;;  %v4656_v54 = vor.u32 %v5699_v50, %v4653_v52  ;;  %v5726_v50 = vld [vmem:[%s7417_s4 + $0x400] sm:$0xff] }
 0x659   :  { %v5750_v52 = vld [vmem:[%s7417_s4 + $0x4c0] sm:$0xff] }
 0x65a   :  { %v2082_v2 = vadd.f32 1e-05, %v2081_v38  ;;  %v4725_v38 = vld [vmem:[%s7416_s3 + $0x1f0] sm:$0xf0] }
 0x65b   :  { %v4728_v63 = vor.u32 %v5716_v57, %v4725_v38  ;;  %v5771_v57 = vld [vmem:[%s7417_s4 + $0x568] sm:$0xff] }
 0x65c   :  { %5885 = vrsqrt.f32 %v2082_v2  ;;  %vm2089_vm14 = vweird.f32 %v2082_v2  ;;  %v5779_v38 = vld [vmem:[%s7417_s4 + $0x5a8] sm:$0xff] }
 0x662   :  { %v5886_v16 = vpop.eup %5885 }
 0x663   :  { %v2084_v17 = vmul.f32 %v5886_v16, %v2082_v2  ;;  %vm2090_vm13 = vweird.f32 %v5886_v16  ;;  %v4736_v2 = vor.u32 %v5717_v60, %v4733_v61  ;;  %v5770_v60 = vld [vmem:[%s7417_s4 + $0x560] sm:$0xff] }
 0x664   :  { %vm2091_vm15 = vmor %vm2089_vm14, %vm2090_vm13  ;;  %v5778_v61 = vld [vmem:[%s7417_s4 + $0x5a0] sm:$0xff] }
 0x665   :  { %v2085_v18 = vmul.f32 %v5886_v16, %v2084_v17  ;;  %v5757_v17 = vld [vmem:[%s7417_s4 + $0x4f8] sm:$0xff] }
 0x667   :  { %v2086_v19 = vmul.f32 0.5, %v2085_v18  ;;  %v5740_v18 = vld [vmem:[%s7417_s4 + $0x470] sm:$0xff] }
 0x669   :  { %v2087_v20 = vsub.f32 1.5, %v2086_v19  ;;  %v5748_v19 = vld [vmem:[%s7417_s4 + $0x4b0] sm:$0xff] }
 0x66b   :  { %v2088_v24 = vmul.f32 %v5886_v16, %v2087_v20  ;;  %v5732_v20 = vld [vmem:[%s7417_s4 + $0x430] sm:$0xff] }
 0x66d   :  { %v2092_v26 = vsel %vm2091_vm15, %v5886_v16, %v2088_v24  ;;  %v5733_v16 = vld [vmem:[%s7417_s4 + $0x438] sm:$0xff]  ;;  %v5756_v24 = vld [vmem:[%s7417_s4 + $0x4f0] sm:$0xff] }
 0x66e   :  { %v2093_v29 = vmul.f32 %v2092_v26, %v6732_v28  ;;  %v4715_v28 = vld [vmem:[%s7416_s3 + $0x1a8] sm:$0xf] }
 0x66f   :  { %v4716_v45 = vor.u32 %v5723_v33, %v4715_v28  ;;  %v5747_v26 = vld [vmem:[%s7417_s4 + $0x4a8] sm:$0xff]  ;;  %v5745_v28 = vld [vmem:[%s7417_s4 + $0x498] sm:$0xff] }
 0x670   :  { %v2095_v30 = vmul.f32 %v5873_v25, %v2093_v29  ;;  %v5739_v25 = vld [vmem:[%s7417_s4 + $0x468] sm:$0xff]  ;;  %v5729_v33 = vld [vmem:[%s7417_s4 + $0x418] sm:$0xff] }
 0x671   :  { %v5755_v29 = vld [vmem:[%s7417_s4 + $0x4e8] sm:$0xff] }
 0x672   :  { %v6856_v11 = vadd.f32 %v5874_v27, %v2095_v30  ;;  %v5731_v27 = vld [vmem:[%s7417_s4 + $0x428] sm:$0xff]  ;;  %v5738_v30 = vld [vmem:[%s7417_s4 + $0x460] sm:$0xff] }
 0x674   :  { %v6869_v36 = vpack.c.bf16 %v6856_v11, %v6856_v11 }
 0x676   :  { %4737 = vmatmul.msk.bf16.vlgmr.msra.gmra.mxu3 %vm246_vm5, %v6869_v36  ;;  %4738 = vmatmul.msk.bf16.vlgmr.msrb.gmra.mxu0 %vm246_vm5, %v6869_v36 }
 0x677   :  { %4739 = vmatmul.msk.bf16.vlgmr.msrb.gmra.mxu1 %vm246_vm5, %v6869_v36  ;;  %4740 = vmatmul.msk.bf16.vlgmr.msrb.gmra.mxu2 %vm246_vm5, %v6869_v36 }
 0x678   :  { %2442 = vmatpush.bf16.msra.mxu3 %v4708_v40  ;;  %2455 = vmatpush.bf16.msrb.mxu0 %v4712_v42  ;;  %v5744_v40 = vld [vmem:[%s7417_s4 + $0x490] sm:$0xff] }
 0x679   :  { %2468 = vmatpush.bf16.msrb.mxu1 %v4716_v45  ;;  %2481 = vmatpush.bf16.msrb.mxu2 %v4720_v46  ;;  %v5728_v42 = vld [vmem:[%s7417_s4 + $0x410] sm:$0xff]  ;;  %v5727_v45 = vld [vmem:[%s7417_s4 + $0x408] sm:$0xff] }
 0x67a   :  { %v5751_v46 = vld [vmem:[%s7417_s4 + $0x4c8] sm:$0xff] }
 0x67c   :  { %2443 = vmatpush.bf16.msra.mxu3 %v4644_v39  ;;  %2456 = vmatpush.bf16.msrb.mxu0 %v4648_v51  ;;  %v5765_v39 = vld [vmem:[%s7417_s4 + $0x538] sm:$0xff] }
 0x67d   :  { %2469 = vmatpush.bf16.msrb.mxu1 %v4652_v53  ;;  %2482 = vmatpush.bf16.msrb.mxu2 %v4656_v54  ;;  %v5789_v51 = vld [vmem:[%s7417_s4 + $0x5f8] sm:$0xff]  ;;  %v5772_v53 = vld [vmem:[%s7417_s4 + $0x570] sm:$0xff] }
 0x67e   :  { %v5780_v54 = vld [vmem:[%s7417_s4 + $0x5b0] sm:$0xff] }
 0x686   :  { %4741 = vmatmul.msk.bf16.vlgmr.msrb.gmra.mxu3 %vm246_vm5, %v6869_v36  ;;  %4742 = vmatmul.msk.bf16.vlgmr.msra.gmra.mxu0 %vm246_vm5, %v6869_v36 }
 0x687   :  { %4743 = vmatmul.msk.bf16.vlgmr.msra.gmra.mxu1 %vm246_vm5, %v6869_v36  ;;  %4744 = vmatmul.msk.bf16.vlgmr.msra.gmra.mxu2 %vm246_vm5, %v6869_v36 }
 0x688   :  { %2494 = vmatpush.bf16.msrb.mxu3 %v4724_v62  ;;  %2507 = vmatpush.bf16.msra.mxu0 %v4728_v63  ;;  %v5762_v62 = vld [vmem:[%s7417_s4 + $0x520] sm:$0xff] }
 0x689   :  { %2520 = vmatpush.bf16.msra.mxu1 %v4732_v1  ;;  %2533 = vmatpush.bf16.msra.mxu2 %v4736_v2  ;;  %v5786_v63 = vld [vmem:[%s7417_s4 + $0x5e0] sm:$0xff]  ;;  %v5768_v1 = vld [vmem:[%s7417_s4 + $0x550] sm:$0xff] }
 0x68a   :  { %v5776_v2 = vld [vmem:[%s7417_s4 + $0x590] sm:$0xff] }
 0x68c   :  { %2495 = vmatpush.bf16.msrb.mxu3 %v4660_v9  ;;  %2508 = vmatpush.bf16.msra.mxu0 %v4664_v10  ;;  %v5766_v9 = vld [vmem:[%s7417_s4 + $0x540] sm:$0xff] }
 0x68d   :  { %2521 = vmatpush.bf16.msra.mxu1 %v4668_v12  ;;  %2534 = vmatpush.bf16.msra.mxu2 %v4672_v13  ;;  %v5774_v10 = vld [vmem:[%s7417_s4 + $0x580] sm:$0xff]  ;;  %v5759_v12 = vld [vmem:[%s7417_s4 + $0x508] sm:$0xff] }
 0x68e   :  { %v5783_v13 = vld [vmem:[%s7417_s4 + $0x5c8] sm:$0xff] }
 0x696   :  { %4745 = vmatmul.msk.bf16.vlgmr.msra.gmra.mxu3 %vm246_vm5, %v6869_v36  ;;  %4746 = vmatmul.msk.bf16.vlgmr.msrb.gmra.mxu0 %vm246_vm5, %v6869_v36 }
 0x697   :  { %4747 = vmatmul.msk.bf16.vlgmr.msrb.gmra.mxu1 %vm246_vm5, %v6869_v36  ;;  %4748 = vmatmul.msk.bf16.vlgmr.msrb.gmra.mxu2 %vm246_vm5, %v6869_v36 }
 0x698   :  { %3611 = vmatpush.bf16.msrb.mxu0 %v5741_v15  ;;  %3624 = vmatpush.bf16.msrb.mxu1 %v5749_v14  ;;  %v5758_v15 = vld [vmem:[%s7417_s4 + $0x500] sm:$0xff] }
 0x699   :  { %3598 = vmatpush.bf16.msra.mxu3 %v5733_v16  ;;  %3637 = vmatpush.bf16.msrb.mxu2 %v5757_v17  ;;  %v5782_v14 = vld [vmem:[%s7417_s4 + $0x5c0] sm:$0xff]  ;;  %v7170_v16 = vld [vmem:[%s7420_s7 + $0x10] sm:$0xff] }
 0x69a   :  { %v2138_v17 = vperm.slane %v7170_v16, 1 }
 0x69c   :  { %3612 = vmatpush.bf16.msrb.mxu0 %v5740_v18  ;;  %3625 = vmatpush.bf16.msrb.mxu1 %v5748_v19  ;;  %v2139_v18 = vperm.slane %v7170_v16, 2 }
 0x69d   :  { %3599 = vmatpush.bf16.msra.mxu3 %v5732_v20  ;;  %3638 = vmatpush.bf16.msrb.mxu2 %v5756_v24 }
 0x6a0   :  { %3613 = vmatpush.bf16.msrb.mxu0 %v5739_v25  ;;  %3626 = vmatpush.bf16.msrb.mxu1 %v5747_v26 }
 0x6a1   :  { %3600 = vmatpush.bf16.msra.mxu3 %v5731_v27  ;;  %3639 = vmatpush.bf16.msrb.mxu2 %v5755_v29  ;;  %v2137_v27 = vperm.slane %v7170_v16, 0 }
 0x6a4   :  { %3614 = vmatpush.bf16.msrb.mxu0 %v5738_v30  ;;  %3627 = vmatpush.bf16.msrb.mxu1 %v5746_v31  ;;  %v2140_v30 = vperm.slane %v7170_v16, 3  ;;  %v5805_v31 = vld [vmem:[%s7417_s4 + $0x678] sm:$0xff] }
 0x6a5   :  { %3601 = vmatpush.bf16.msra.mxu3 %v5730_v32  ;;  %3640 = vmatpush.bf16.msrb.mxu2 %v5754_v22  ;;  %v5813_v22 = vld [vmem:[%s7417_s4 + $0x6b8] sm:$0xff] }
 0x6a6   :  { %4749 = vmatmul.msk.bf16.vlgmr.msrb.gmra.mxu3 %vm246_vm5, %v6869_v36  ;;  %4750 = vmatmul.msk.bf16.vlgmr.msra.gmra.mxu0 %vm246_vm5, %v6869_v36 }
 0x6a7   :  { %4751 = vmatmul.msk.bf16.vlgmr.msra.gmra.mxu1 %vm246_vm5, %v6869_v36  ;;  %4752 = vmatmul.msk.bf16.vlgmr.msra.gmra.mxu2 %vm246_vm5, %v6869_v36  ;;  %v5752_v36 = vld [vmem:[%s7417_s4 + $0x4d0] sm:$0xff] }
 0x6a8   :  { %3615 = vmatpush.bf16.msrb.mxu0 %v5737_v23  ;;  %3628 = vmatpush.bf16.msrb.mxu1 %v5745_v28 }
 0x6a9   :  { %3602 = vmatpush.bf16.msra.mxu3 %v5729_v33  ;;  %3641 = vmatpush.bf16.msrb.mxu2 %v5753_v34 }
 0x6ac   :  { %3616 = vmatpush.bf16.msrb.mxu0 %v5736_v35  ;;  %3629 = vmatpush.bf16.msrb.mxu1 %v5744_v40 }
 0x6ad   :  { %3603 = vmatpush.bf16.msra.mxu3 %v5728_v42  ;;  %3642 = vmatpush.bf16.msrb.mxu2 %v5752_v36  ;;  %v5804_v42 = vld [vmem:[%s7417_s4 + $0x670] sm:$0xff] }
 0x6b0   :  { %3617 = vmatpush.bf16.msrb.mxu0 %v5735_v43  ;;  %3630 = vmatpush.bf16.msrb.mxu1 %v5743_v44  ;;  %v5812_v44 = vld [vmem:[%s7417_s4 + $0x6b0] sm:$0xff] }
 0x6b1   :  { %3604 = vmatpush.bf16.msra.mxu3 %v5727_v45  ;;  %3643 = vmatpush.bf16.msrb.mxu2 %v5751_v46  ;;  %v5797_v46 = vld [vmem:[%s7417_s4 + $0x638] sm:$0xff] }
 0x6b4   :  { %3618 = vmatpush.bf16.msrb.mxu0 %v5734_v47  ;;  %3631 = vmatpush.bf16.msrb.mxu1 %v5742_v41  ;;  %v5821_v41 = vld [vmem:[%s7417_s4 + $0x6f8] sm:$0xff] }
 0x6b5   :  { %3605 = vmatpush.bf16.msra.mxu3 %v5726_v50  ;;  %3644 = vmatpush.bf16.msrb.mxu2 %v5750_v52  ;;  %v5811_v50 = vld [vmem:[%s7417_s4 + $0x6a8] sm:$0xff]  ;;  %v2142_v52 = vperm.slane %v7170_v16, 5 }
 0x6b8   :  { %3663 = vmatpush.bf16.msra.mxu0 %v5773_v48  ;;  %3676 = vmatpush.bf16.msra.mxu1 %v5781_v49  ;;  %v5803_v49 = vld [vmem:[%s7417_s4 + $0x668] sm:$0xff] }
 0x6b9   :  { %3650 = vmatpush.bf16.msrb.mxu3 %v5765_v39  ;;  %3689 = vmatpush.bf16.msra.mxu2 %v5789_v51  ;;  %v2143_v51 = vperm.slane %v7170_v16, 6 }
 0x6bc   :  { %3664 = vmatpush.bf16.msra.mxu0 %v5772_v53  ;;  %3677 = vmatpush.bf16.msra.mxu1 %v5780_v54  ;;  %v5796_v53 = vld [vmem:[%s7417_s4 + $0x630] sm:$0xff] }
 0x6bd   :  { %3651 = vmatpush.bf16.msrb.mxu3 %v5764_v55  ;;  %3690 = vmatpush.bf16.msra.mxu2 %v5788_v56  ;;  %v5820_v55 = vld [vmem:[%s7417_s4 + $0x6f0] sm:$0xff] }
 0x6c0   :  { %3665 = vmatpush.bf16.msra.mxu0 %v5771_v57  ;;  %3678 = vmatpush.bf16.msra.mxu1 %v5779_v38  ;;  %v5802_v57 = vld [vmem:[%s7417_s4 + $0x660] sm:$0xff] }
 0x6c1   :  { %3652 = vmatpush.bf16.msrb.mxu3 %v5763_v58  ;;  %3691 = vmatpush.bf16.msra.mxu2 %v5787_v59  ;;  %v5810_v59 = vld [vmem:[%s7417_s4 + $0x6a0] sm:$0xff] }
 0x6c4   :  { %3666 = vmatpush.bf16.msra.mxu0 %v5770_v60  ;;  %3679 = vmatpush.bf16.msra.mxu1 %v5778_v61  ;;  %v5795_v61 = vld [vmem:[%s7417_s4 + $0x628] sm:$0xff] }
 0x6c5   :  { %3653 = vmatpush.bf16.msrb.mxu3 %v5762_v62  ;;  %3692 = vmatpush.bf16.msra.mxu2 %v5786_v63  ;;  %v5819_v63 = vld [vmem:[%s7417_s4 + $0x6e8] sm:$0xff] }
 0x6c8   :  { %3667 = vmatpush.bf16.msra.mxu0 %v5769_v21  ;;  %3680 = vmatpush.bf16.msra.mxu1 %v5777_v0  ;;  %v2141_v21 = vperm.slane %v7170_v16, 4 }
 0x6c9   :  { %3654 = vmatpush.bf16.msrb.mxu3 %v5761_v3  ;;  %3693 = vmatpush.bf16.msra.mxu2 %v5785_v4  ;;  %v5809_v4 = vld [vmem:[%s7417_s4 + $0x698] sm:$0xff] }
 0x6cc   :  { %3668 = vmatpush.bf16.msra.mxu0 %v5768_v1  ;;  %3681 = vmatpush.bf16.msra.mxu1 %v5776_v2  ;;  %v2144_v1 = vperm.slane %v7170_v16, 7  ;;  %v5801_v2 = vld [vmem:[%s7417_s4 + $0x658] sm:$0xff] }
 0x6cd   :  { %3655 = vmatpush.bf16.msrb.mxu3 %v5760_v7  ;;  %3694 = vmatpush.bf16.msra.mxu2 %v5784_v8  ;;  %v5794_v7 = vld [vmem:[%s7417_s4 + $0x620] sm:$0xff] }
 0x6d0   :  { %3669 = vmatpush.bf16.msra.mxu0 %v5767_v5  ;;  %3682 = vmatpush.bf16.msra.mxu1 %v5775_v6 }
 0x6d1   :  { %3656 = vmatpush.bf16.msrb.mxu3 %v5759_v12  ;;  %3695 = vmatpush.bf16.msra.mxu2 %v5783_v13 }
 0x6d4   :  { %3670 = vmatpush.bf16.msra.mxu0 %v5766_v9  ;;  %3683 = vmatpush.bf16.msra.mxu1 %v5774_v10  ;;  %v5818_v10 = vld [vmem:[%s7417_s4 + $0x6e0] sm:$0xff] }
 0x6d5   :  { %3657 = vmatpush.bf16.msrb.mxu3 %v5758_v15  ;;  %3696 = vmatpush.bf16.msra.mxu2 %v5782_v14  ;;  %v5800_v15 = vld [vmem:[%s7417_s4 + $0x650] sm:$0xff] }
 0x6f3   :  { %v2354_v19 = vpop.f32.mrf.mxu0 }
 0x6f4   :  { %v2355_v20 = vadd.f32 %v2354_v19, %v2138_v17  ;;  %v2367_v24 = vpop.f32.mrf.mxu1  ;;  %v5808_v17 = vld [vmem:[%s7417_s4 + $0x690] sm:$0xff]  ;;  %v5793_v19 = vld [vmem:[%s7417_s4 + $0x618] sm:$0xff] }
 0x6f5   :  { %v2368_v25 = vadd.f32 %v2367_v24, %v2139_v18 }
 0x6f6   :  { %v2541_v26 = vmax.f32 %v2355_v20, 0.0  ;;  %v7246_v20 = vld [vmem:[%s7420_s7 + $0x18] sm:$0xff] }
 0x6f7   :  { %v2542_v29 = vmax.f32 %v2368_v25, 0.0  ;;  %v5817_v25 = vld [vmem:[%s7417_s4 + $0x6d8] sm:$0xff] }
 0x6f8   :  { %v2557_v32 = vpack.c.bf16 %v2541_v26, %v2541_v26 }
 0x6f9   :  { %v2558_v23 = vpack.c.bf16 %v2542_v29, %v2542_v29  ;;  %v2341_v28 = vpop.f32.mrf.mxu3  ;;  %v5807_v29 = vld [vmem:[%s7417_s4 + $0x688] sm:$0xff] }
 0x6fa   :  { %v2342_v33 = vadd.f32 %v2341_v28, %v2137_v27  ;;  %v2380_v34 = vpop.f32.mrf.mxu2  ;;  %3619 = vmatmul.bf16.vlgmr.msrb.gmra.mxu0 %v2557_v32  ;;  %v5799_v27 = vld [vmem:[%s7417_s4 + $0x648] sm:$0xff]  ;;  %v2147_v32 = vperm.slane %v7246_v20, 2  ;;  %v5816_v28 = vld [vmem:[%s7417_s4 + $0x6d0] sm:$0xff] }
 0x6fb   :  { %v2381_v35 = vadd.f32 %v2380_v34, %v2140_v30  ;;  %3632 = vmatmul.bf16.vlgmr.msrb.gmra.mxu1 %v2558_v23  ;;  %3715 = vmatpush.bf16.msrb.mxu0 %v5805_v31  ;;  %v2356_v40 = vpop.f32.mrf.mxu0  ;;  %v2146_v30 = vperm.slane %v7246_v20, 1  ;;  %v5798_v34 = vld [vmem:[%s7417_s4 + $0x640] sm:$0xff] }
 0x6fc   :  { %v2540_v36 = vmax.f32 %v2342_v33, 0.0  ;;  %3728 = vmatpush.bf16.msrb.mxu1 %v5813_v22  ;;  %v2369_v43 = vpop.f32.mrf.mxu1  ;;  %v5792_v22 = vld [vmem:[%s7417_s4 + $0x610] sm:$0xff] }
 0x6fd   :  { %v2543_v45 = vmax.f32 %v2381_v35, 0.0 }
 0x6fe   :  { %v2556_v47 = vpack.c.bf16 %v2540_v36, %v2540_v36  ;;  %v5837_v36 = vld [vmem:[%s7417_s4 + $0x778] sm:$0xff] }
 0x6ff   :  { %v2559_v48 = vpack.c.bf16 %v2543_v45, %v2543_v45  ;;  %3716 = vmatpush.bf16.msrb.mxu0 %v5804_v42  ;;  %v5806_v42 = vld [vmem:[%s7417_s4 + $0x680] sm:$0xff]  ;;  %v5791_v45 = vld [vmem:[%s7417_s4 + $0x608] sm:$0xff] }
 0x700   :  { %3729 = vmatpush.bf16.msrb.mxu1 %v5812_v44  ;;  %3606 = vmatmul.bf16.vlgmr.msra.gmra.mxu3 %v2556_v47  ;;  %v5845_v44 = vld [vmem:[%s7417_s4 + $0x7b8] sm:$0xff]  ;;  %v5815_v47 = vld [vmem:[%s7417_s4 + $0x6c8] sm:$0xff] }
 0x701   :  { %3645 = vmatmul.bf16.vlgmr.msrb.gmra.mxu2 %v2559_v48  ;;  %3702 = vmatpush.bf16.msra.mxu3 %v5797_v46  ;;  %v2343_v39 = vpop.f32.mrf.mxu3 }
 0x702   :  { %3741 = vmatpush.bf16.msrb.mxu2 %v5821_v41  ;;  %v2382_v54 = vpop.f32.mrf.mxu2  ;;  %v2145_v41 = vperm.slane %v7246_v20, 0 }
 0x703   :  { %3717 = vmatpush.bf16.msrb.mxu0 %v5803_v49  ;;  %v2406_v56 = vpop.f32.mrf.mxu0  ;;  %v2148_v49 = vperm.slane %v7246_v20, 3  ;;  %v5790_v54 = vld [vmem:[%s7417_s4 + $0x600] sm:$0xff] }
 0x704   :  { %3730 = vmatpush.bf16.msrb.mxu1 %v5811_v50  ;;  %v2407_v38 = vadd.f32 %v2406_v56, %v2142_v52  ;;  %v2419_v58 = vpop.f32.mrf.mxu1  ;;  %v5836_v52 = vld [vmem:[%s7417_s4 + $0x770] sm:$0xff] }
 0x705   :  { %v2420_v60 = vadd.f32 %v2419_v58, %v2143_v51  ;;  %3703 = vmatpush.bf16.msra.mxu3 %v5796_v53  ;;  %v5844_v53 = vld [vmem:[%s7417_s4 + $0x7b0] sm:$0xff] }
 0x706   :  { %v2545_v62 = vmax.f32 %v2407_v38, 0.0  ;;  %3742 = vmatpush.bf16.msrb.mxu2 %v5820_v55  ;;  %v5829_v38 = vld [vmem:[%s7417_s4 + $0x738] sm:$0xff] }
 0x707   :  { %v2546_v0 = vmax.f32 %v2420_v60, 0.0  ;;  %3718 = vmatpush.bf16.msrb.mxu0 %v5802_v57  ;;  %v5814_v57 = vld [vmem:[%s7417_s4 + $0x6c0] sm:$0xff]  ;;  %v5853_v60 = vld [vmem:[%s7417_s4 + $0x7f8] sm:$0xff] }
 0x708   :  { %v2561_v3 = vpack.c.bf16 %v2545_v62, %v2545_v62  ;;  %3731 = vmatpush.bf16.msrb.mxu1 %v5810_v59 }
 0x709   :  { %v2562_v5 = vpack.c.bf16 %v2546_v0, %v2546_v0  ;;  %3704 = vmatpush.bf16.msra.mxu3 %v5795_v61  ;;  %v2393_v6 = vpop.f32.mrf.mxu3  ;;  %v5843_v0 = vld [vmem:[%s7417_s4 + $0x7a8] sm:$0xff] }
 0x70a   :  { %3743 = vmatpush.bf16.msrb.mxu2 %v5819_v63  ;;  %v2394_v8 = vadd.f32 %v2393_v6, %v2141_v21  ;;  %v2432_v9 = vpop.f32.mrf.mxu2  ;;  %3671 = vmatmul.bf16.vlgmr.msra.gmra.mxu0 %v2561_v3  ;;  %v5835_v63 = vld [vmem:[%s7417_s4 + $0x768] sm:$0xff] }
 0x70b   :  { %v2433_v12 = vadd.f32 %v2432_v9, %v2144_v1  ;;  %3684 = vmatmul.bf16.vlgmr.msra.gmra.mxu1 %v2562_v5  ;;  %3719 = vmatpush.bf16.msrb.mxu0 %v5801_v2  ;;  %v2408_v13 = vpop.f32.mrf.mxu0  ;;  %v5828_v2 = vld [vmem:[%s7417_s4 + $0x730] sm:$0xff]  ;;  %v5834_v5 = vld [vmem:[%s7417_s4 + $0x760] sm:$0xff]  ;;  %v5827_v9 = vld [vmem:[%s7417_s4 + $0x728] sm:$0xff] }
 0x70c   :  { %v2544_v14 = vmax.f32 %v2394_v8, 0.0  ;;  %3732 = vmatpush.bf16.msrb.mxu1 %v5809_v4  ;;  %v2421_v16 = vpop.f32.mrf.mxu1  ;;  %v5852_v4 = vld [vmem:[%s7417_s4 + $0x7f0] sm:$0xff] }
 0x70d   :  { %v2547_v18 = vmax.f32 %v2433_v12, 0.0  ;;  %3705 = vmatpush.bf16.msra.mxu3 %v5794_v7  ;;  %v5842_v7 = vld [vmem:[%s7417_s4 + $0x7a0] sm:$0xff]  ;;  %v5851_v12 = vld [vmem:[%s7417_s4 + $0x7e8] sm:$0xff] }
 0x70e   :  { %v2560_v24 = vpack.c.bf16 %v2544_v14, %v2544_v14  ;;  %3744 = vmatpush.bf16.msrb.mxu2 %v5818_v10  ;;  %v5841_v14 = vld [vmem:[%s7417_s4 + $0x798] sm:$0xff]  ;;  %v5826_v16 = vld [vmem:[%s7417_s4 + $0x720] sm:$0xff] }
 0x70f   :  { %v2563_v26 = vpack.c.bf16 %v2547_v18, %v2547_v18  ;;  %3720 = vmatpush.bf16.msrb.mxu0 %v5800_v15  ;;  %v5833_v15 = vld [vmem:[%s7417_s4 + $0x758] sm:$0xff]  ;;  %v5832_v18 = vld [vmem:[%s7417_s4 + $0x750] sm:$0xff] }
 0x710   :  { %3733 = vmatpush.bf16.msrb.mxu1 %v5808_v17  ;;  %3658 = vmatmul.bf16.vlgmr.msrb.gmra.mxu3 %v2560_v24  ;;  %v5850_v17 = vld [vmem:[%s7417_s4 + $0x7e0] sm:$0xff] }
 0x711   :  { %3697 = vmatmul.bf16.vlgmr.msra.gmra.mxu2 %v2563_v26  ;;  %3706 = vmatpush.bf16.msra.mxu3 %v5793_v19  ;;  %v2395_v31 = vpop.f32.mrf.mxu3  ;;  %v2150_v19 = vperm.slane %v7246_v20, 5  ;;  %v2151_v26 = vperm.slane %v7246_v20, 6 }
 0x712   :  { %3745 = vmatpush.bf16.msrb.mxu2 %v5817_v25  ;;  %v2434_v23 = vpop.f32.mrf.mxu2  ;;  %v5840_v25 = vld [vmem:[%s7417_s4 + $0x790] sm:$0xff]  ;;  %v5849_v31 = vld [vmem:[%s7417_s4 + $0x7d8] sm:$0xff] }
 0x713   :  { %3721 = vmatpush.bf16.msrb.mxu0 %v5799_v27  ;;  %v2458_v33 = vpop.f32.mrf.mxu0 }
 0x714   :  { %3734 = vmatpush.bf16.msrb.mxu1 %v5807_v29  ;;  %v2459_v35 = vadd.f32 %v2458_v33, %v2146_v30  ;;  %v2471_v40 = vpop.f32.mrf.mxu1  ;;  %v5825_v29 = vld [vmem:[%s7417_s4 + $0x718] sm:$0xff] }
 0x715   :  { %v2472_v43 = vadd.f32 %v2471_v40, %v2147_v32  ;;  %3707 = vmatpush.bf16.msra.mxu3 %v5792_v22  ;;  %v5831_v22 = vld [vmem:[%s7417_s4 + $0x748] sm:$0xff]  ;;  %v5848_v40 = vld [vmem:[%s7417_s4 + $0x7d0] sm:$0xff] }
 0x716   :  { %v2549_v46 = vmax.f32 %v2459_v35, 0.0  ;;  %3746 = vmatpush.bf16.msrb.mxu2 %v5816_v28  ;;  %v5839_v28 = vld [vmem:[%s7417_s4 + $0x788] sm:$0xff]  ;;  %v2149_v35 = vperm.slane %v7246_v20, 4 }
 0x717   :  { %v2550_v48 = vmax.f32 %v2472_v43, 0.0  ;;  %3722 = vmatpush.bf16.msrb.mxu0 %v5798_v34  ;;  %v5824_v34 = vld [vmem:[%s7417_s4 + $0x710] sm:$0xff] }
 0x718   :  { %v2565_v50 = vpack.c.bf16 %v2549_v46, %v2549_v46  ;;  %3735 = vmatpush.bf16.msrb.mxu1 %v5806_v42  ;;  %v2152_v42 = vperm.slane %v7246_v20, 7 }
 0x719   :  { %v2566_v39 = vpack.c.bf16 %v2550_v48, %v2550_v48  ;;  %3708 = vmatpush.bf16.msra.mxu3 %v5791_v45  ;;  %v2445_v51 = vpop.f32.mrf.mxu3  ;;  %v5838_v45 = vld [vmem:[%s7417_s4 + $0x780] sm:$0xff]  ;;  %v5847_v48 = vld [vmem:[%s7417_s4 + $0x7c8] sm:$0xff] }
 0x71a   :  { %3747 = vmatpush.bf16.msrb.mxu2 %v5815_v47  ;;  %v2446_v55 = vadd.f32 %v2445_v51, %v2145_v41  ;;  %v2484_v56 = vpop.f32.mrf.mxu2  ;;  %3723 = vmatmul.bf16.vlgmr.msrb.gmra.mxu0 %v2565_v50  ;;  %v5823_v41 = vld [vmem:[%s7417_s4 + $0x708] sm:$0xff] }
 0x71b   :  { %3767 = vmatpush.bf16.msra.mxu0 %v5837_v36  ;;  %v2485_v58 = vadd.f32 %v2484_v56, %v2148_v49  ;;  %3736 = vmatmul.bf16.vlgmr.msrb.gmra.mxu1 %v2566_v39  ;;  %v2460_v59 = vpop.f32.mrf.mxu0  ;;  %v5830_v36 = vld [vmem:[%s7417_s4 + $0x740] sm:$0xff] }
 0x71c   :  { %3780 = vmatpush.bf16.msra.mxu1 %v5845_v44  ;;  %v2548_v61 = vmax.f32 %v2446_v55, 0.0  ;;  %v2473_v62 = vpop.f32.mrf.mxu1  ;;  %v5822_v39 = vld [vmem:[%s7417_s4 + $0x700] sm:$0xff] }
 0x71d   :  { %v2551_v21 = vmax.f32 %v2485_v58, 0.0  ;;  %3709 = vmatpush.bf16.msra.mxu3 %v5790_v54 }
 0x71e   :  { %v2564_v1 = vpack.c.bf16 %v2548_v61, %v2548_v61  ;;  %3748 = vmatpush.bf16.msrb.mxu2 %v5814_v57 }
 0x71f   :  { %3768 = vmatpush.bf16.msra.mxu0 %v5836_v52  ;;  %v2567_v3 = vpack.c.bf16 %v2551_v21, %v2551_v21 }
 0x720   :  { %3781 = vmatpush.bf16.msra.mxu1 %v5844_v53  ;;  %3710 = vmatmul.bf16.vlgmr.msra.gmra.mxu3 %v2564_v1  ;;  %v5846_v53 = vld [vmem:[%s7417_s4 + $0x7c0] sm:$0xff] }
 0x721   :  { %3754 = vmatpush.bf16.msrb.mxu3 %v5829_v38  ;;  %3749 = vmatmul.bf16.vlgmr.msrb.gmra.mxu2 %v2567_v3  ;;  %v2447_v6 = vpop.f32.mrf.mxu3  ;;  %v5875_v3 = vld [vmem:[%s7419_s6 + $0xb] ss:$0 sm:$0xff] }
 0x722   :  { %3793 = vmatpush.bf16.msra.mxu2 %v5853_v60  ;;  %v2486_v8 = vpop.f32.mrf.mxu2 }
 0x723   :  { %3769 = vmatpush.bf16.msra.mxu0 %v5835_v63  ;;  %v2510_v10 = vpop.f32.mrf.mxu0 }
 0x724   :  { %3782 = vmatpush.bf16.msra.mxu1 %v5843_v0  ;;  %v2523_v13 = vpop.f32.mrf.mxu1  ;;  %v2511_v23 = vadd.f32 %v2510_v10, %v2150_v19 }
 0x725   :  { %3755 = vmatpush.bf16.msrb.mxu3 %v5828_v2  ;;  %v2524_v33 = vadd.f32 %v2523_v13, %v2151_v26 }
 0x726   :  { %3794 = vmatpush.bf16.msra.mxu2 %v5852_v4  ;;  %v2553_v43 = vmax.f32 %v2511_v23, 0.0 }
 0x727   :  { %3770 = vmatpush.bf16.msra.mxu0 %v5834_v5  ;;  %v2554_v46 = vmax.f32 %v2524_v33, 0.0 }
 0x728   :  { %3783 = vmatpush.bf16.msra.mxu1 %v5842_v7  ;;  %v2569_v50 = vpack.c.bf16 %v2553_v43, %v2553_v43 }
 0x729   :  { %3756 = vmatpush.bf16.msrb.mxu3 %v5827_v9  ;;  %v2497_v24 = vpop.f32.mrf.mxu3  ;;  %v2570_v52 = vpack.c.bf16 %v2554_v46, %v2554_v46 }
 0x72a   :  { %3795 = vmatpush.bf16.msra.mxu2 %v5851_v12  ;;  %v2536_v27 = vpop.f32.mrf.mxu2  ;;  %v2498_v20 = vadd.f32 %v2497_v24, %v2149_v35 }
 0x72b   :  { %3771 = vmatpush.bf16.msra.mxu0 %v5833_v15  ;;  %v2512_v30 = vpop.f32.mrf.mxu0  ;;  %v2537_v49 = vadd.f32 %v2536_v27, %v2152_v42 }
 0x72c   :  { %3784 = vmatpush.bf16.msra.mxu1 %v5841_v14  ;;  %v2525_v32 = vpop.f32.mrf.mxu1  ;;  %v2552_v51 = vmax.f32 %v2498_v20, 0.0 }
 0x72d   :  { %3757 = vmatpush.bf16.msrb.mxu3 %v5826_v16  ;;  %v2555_v54 = vmax.f32 %v2537_v49, 0.0 }
 0x72e   :  { %3796 = vmatpush.bf16.msra.mxu2 %v5850_v17  ;;  %v2568_v55 = vpack.c.bf16 %v2552_v51, %v2552_v51 }
 0x72f   :  { %3772 = vmatpush.bf16.msra.mxu0 %v5832_v18  ;;  %v2571_v56 = vpack.c.bf16 %v2555_v54, %v2555_v54 }
 0x730   :  { %3785 = vmatpush.bf16.msra.mxu1 %v5840_v25 }
 0x731   :  { %3758 = vmatpush.bf16.msrb.mxu3 %v5825_v29  ;;  %v2499_v44 = vpop.f32.mrf.mxu3 }
 0x732   :  { %3797 = vmatpush.bf16.msra.mxu2 %v5849_v31  ;;  %v2538_v47 = vpop.f32.mrf.mxu2 }
 0x733   :  { %3773 = vmatpush.bf16.msra.mxu0 %v5831_v22 }
 0x734   :  { %3786 = vmatpush.bf16.msra.mxu1 %v5839_v28 }
 0x735   :  { %3759 = vmatpush.bf16.msrb.mxu3 %v5824_v34 }
 0x736   :  { %3798 = vmatpush.bf16.msra.mxu2 %v5848_v40 }
 0x737   :  { %3774 = vmatpush.bf16.msra.mxu0 %v5830_v36 }
 0x738   :  { %3787 = vmatpush.bf16.msra.mxu1 %v5838_v45 }
 0x739   :  { %3760 = vmatpush.bf16.msrb.mxu3 %v5823_v41 }
 0x73a   :  { %3799 = vmatpush.bf16.msra.mxu2 %v5847_v48  ;;  %3775 = vmatmul.bf16.vlgmr.msra.gmra.mxu0 %v2569_v50 }
 0x73b   :  { %3788 = vmatmul.bf16.vlgmr.msra.gmra.mxu1 %v2570_v52 }
 0x73d   :  { %3761 = vmatpush.bf16.msrb.mxu3 %v5822_v39  ;;  %v5855_v39 = vld [vmem:[%s7418_s5 + $0x8] sm:$0xff] }
 0x73e   :  { %3800 = vmatpush.bf16.msra.mxu2 %v5846_v53 }
 0x740   :  { %3762 = vmatmul.bf16.vlgmr.msrb.gmra.mxu3 %v2568_v55 }
 0x741   :  { %3801 = vmatmul.bf16.vlgmr.msra.gmra.mxu2 %v2571_v56  ;;  %3863 = vmatpush.bf16.msra.mxu3 %v5855_v39 }
 0x777   :  { %v3620_v57 = vpop.f32.mrf.mxu0 }
 0x778   :  { %v3633_v38 = vpop.f32.mrf.mxu1 }
 0x77f   :  { %v3622_v58 = vpop.f32.mrf.mxu0 }
 0x780   :  { %v3635_v59 = vpop.f32.mrf.mxu1 }
 0x783   :  { %v3607_v60 = vpop.f32.mrf.mxu3 }
 0x784   :  { %v3646_v61 = vpop.f32.mrf.mxu2  ;;  %v3608_v6 = vadd.f32 %v5875_v3, %v3607_v60  ;;  %v5876_v60 = vld [vmem:[%s7419_s6 + $0xc] ss:$0 sm:$0xff] }
 0x786   :  { %v3621_v9 = vadd.f32 %v3620_v57, %v3608_v6 }
 0x787   :  { %v3672_v62 = vpop.f32.mrf.mxu0 }
 0x788   :  { %v3685_v63 = vpop.f32.mrf.mxu1  ;;  %v3634_v13 = vadd.f32 %v3633_v38, %v3621_v9 }
 0x78a   :  { %v3647_v16 = vadd.f32 %v3646_v61, %v3634_v13 }
 0x78b   :  { %v3609_v21 = vpop.f32.mrf.mxu3 }
 0x78c   :  { %v3648_v0 = vpop.f32.mrf.mxu2 }
 0x78f   :  { %v3674_v1 = vpop.f32.mrf.mxu0 }
 0x790   :  { %v3687_v2 = vpop.f32.mrf.mxu1  ;;  %v5878_v1 = vld [vmem:[%s7421_s8] ss:$0 sm:$0xff] }
 0x793   :  { %v3659_v4 = vpop.f32.mrf.mxu3 }
 0x794   :  { %v3698_v5 = vpop.f32.mrf.mxu2  ;;  %v3660_v19 = vadd.f32 %v3659_v4, %v3647_v16 }
 0x796   :  { %v3673_v24 = vadd.f32 %v3672_v62, %v3660_v19 }
 0x797   :  { %v3724_v7 = vpop.f32.mrf.mxu0 }
 0x798   :  { %v3737_v8 = vpop.f32.mrf.mxu1  ;;  %v3686_v27 = vadd.f32 %v3685_v63, %v3673_v24 }
 0x79a   :  { %v3699_v29 = vadd.f32 %v3698_v5, %v3686_v27 }
 0x79b   :  { %v3661_v10 = vpop.f32.mrf.mxu3 }
 0x79c   :  { %v3700_v12 = vpop.f32.mrf.mxu2 }
 0x79f   :  { %v3726_v15 = vpop.f32.mrf.mxu0 }
 0x7a0   :  { %v3739_v14 = vpop.f32.mrf.mxu1 }
 0x7a3   :  { %v3711_v17 = vpop.f32.mrf.mxu3 }
 0x7a4   :  { %v3750_v18 = vpop.f32.mrf.mxu2  ;;  %v3712_v30 = vadd.f32 %v3711_v17, %v3699_v29 }
 0x7a6   :  { %v3725_v22 = vadd.f32 %v3724_v7, %v3712_v30 }
 0x7a8   :  { %v3738_v23 = vadd.f32 %v3737_v8, %v3725_v22 }
 0x7aa   :  { %v3751_v34 = vadd.f32 %v3750_v18, %v3738_v23 }
 0x7ab   :  { %v3713_v25 = vpop.f32.mrf.mxu3 }
 0x7ac   :  { %v3752_v26 = vpop.f32.mrf.mxu2 }
 0x7b7   :  { %v3776_v31 = vpop.f32.mrf.mxu0 }
 0x7b8   :  { %v3789_v32 = vpop.f32.mrf.mxu1 }
 0x7bf   :  { %v3778_v28 = vpop.f32.mrf.mxu0 }
 0x7c0   :  { %v3791_v33 = vpop.f32.mrf.mxu1 }
 0x7c3   :  { %v3763_v35 = vpop.f32.mrf.mxu3 }
 0x7c4   :  { %v3764_v40 = vadd.f32 %v3763_v35, %v3751_v34  ;;  %v3802_v42 = vpop.f32.mrf.mxu2 }
 0x7c6   :  { %v3777_v36 = vadd.f32 %v3776_v31, %v3764_v40 }
 0x7c8   :  { %v3790_v43 = vadd.f32 %v3789_v32, %v3777_v36 }
 0x7ca   :  { %v3803_v44 = vadd.f32 %v3802_v42, %v3790_v43 }
 0x7cb   :  { %v3765_v45 = vpop.f32.mrf.mxu3 }
 0x7cc   :  { %v3804_v46 = vpop.f32.mrf.mxu2  ;;  %v3806_v47 = vadd.f32 %v3803_v44, %v6856_v11  ;;  %v5854_v11 = vld [vmem:[%s7418_s5] sm:$0xff] }
 0x7cd   :  { %3864 = vmatpush.bf16.msra.mxu3 %v5854_v11 }
 0x7ce   :  { %v3807_v41 = vsel %vm246_vm5, %v3806_v47, 0.0 }
 0x7cf   :  { %3808 = vadd.xlane.f32.xlu0 %v3807_v41 }
 0x842   :  { %v3809_v20 = vpop.xlane.xlu0 %3808 }
 0x843   :  { %v3810_v48 = vmul.f32 %v3809_v20, %v6050_v37 }
 0x845   :  { %v3811_v49 = vsub.f32 %v3806_v47, %v3810_v48 }
 0x847   :  { %v3812_v50 = vmul.f32 %v3811_v49, %v3811_v49 }
 0x849   :  { %v3813_v52 = vsel %vm246_vm5, %v3812_v50, 0.0 }
 0x84a   :  { %3814 = vadd.xlane.f32.xlu1 %v3813_v52 }
 0x8bd   :  { %v3815_v51 = vpop.xlane.xlu1 %3814 }
 0x8be   :  { %v3816_v53 = vmul.f32 %v3815_v51, %v6050_v37  ;;  %v5877_v37 = vld [vmem:[%s7419_s6 + $0xd] ss:$0 sm:$0xff] }
 0x8c0   :  { %v3817_v54 = vadd.f32 1e-05, %v3816_v53 }
 0x8c2   :  { %5887 = vrsqrt.f32 %v3817_v54  ;;  %vm3824_vm2 = vweird.f32 %v3817_v54 }
 0x8c8   :  { %v5888_v55 = vpop.eup %5887 }
 0x8c9   :  { %v3819_v56 = vmul.f32 %v5888_v55, %v3817_v54  ;;  %vm3825_vm1 = vweird.f32 %v5888_v55 }
 0x8ca   :  { %vm3826_vm3 = vmor %vm3824_vm2, %vm3825_vm1 }
 0x8cb   :  { %v3820_v57 = vmul.f32 %v5888_v55, %v3819_v56 }
 0x8cd   :  { %v3821_v38 = vmul.f32 0.5, %v3820_v57 }
 0x8cf   :  { %v3822_v58 = vsub.f32 1.5, %v3821_v38 }
 0x8d1   :  { %v3823_v59 = vmul.f32 %v5888_v55, %v3822_v58 }
 0x8d3   :  { %v3827_v61 = vsel %vm3826_vm3, %v5888_v55, %v3823_v59 }
 0x8d4   :  { %v3828_v62 = vmul.f32 %v3827_v61, %v3811_v49 }
 0x8d6   :  { %v3830_v63 = vmul.f32 %v5876_v60, %v3828_v62 }
 0x8d8   :  { %v3832_v21 = vadd.f32 %v5877_v37, %v3830_v63 }
 0x8da   :  { %v3833_v0 = vpack.c.bf16 %v3832_v21, %v3832_v21 }
 0x8dc   :  { %5529 = vmatmul.msk.bf16.vlgmr.msra.gmra.mxu3 %vm246_vm5, %v3833_v0 }
 0x95f   :  { %v3866_v2 = vpop.f32.mrf.mxu3 }
 0x960   :  { %v3867_v3 = vadd.f32 %v5878_v1, %v3866_v2 }
 0x962   :  { %3870 = vst.msk [vmem:[#allocation2] sm:$0xff] %vm37_vm0, %v3867_v3 }
 0x963   :  { %3881 = dma.vmem_to_hbm [thread:$0]  %s3877_s14, 128, %s3879_s17, [#allocation3]  }
 0x967   :  { %v3868_v4 = vpop.f32.mrf.mxu3 }
 0x968   :  { %5913 = dma.done.wait [#allocation3], 128  }
 0x969   :  { %5914 = vsyncadd [#allocation3], 4294967168 }
 0x96a   :  { %3886 = vsyncpa [#allocation3], 1 }

</bundles_post_ra>
